<compile_context>
chip_gen: v6e
topology: v6e:2x2x1
jax: 0.10.0
libtpu: 0.0.40
codegen_flags: <defaults>
</compile_context>

<pallas_src>
import numpy as np
import jax
import jax.numpy as jnp
from jax.experimental import pallas as pl
from jax.experimental.pallas import tpu as pltpu


# ------------------------------ model config ------------------------------- #

INPUT_DIM = 16
LAST_HIDDEN = 32
LAT_PAD = 128                                               # latent dim padded to lane width
ENC_CH = (1, 8, 16, 32)
DEC_CH = (32, 16, 8, 1)
DEC_SPATIAL = INPUT_DIM // 2 ** (len(DEC_CH) - 1)           # 2
FLAT_DIM = DEC_SPATIAL ** 2 * ENC_CH[-1]                    # 128
IN_FLAT = ENC_CH[0] * INPUT_DIM * INPUT_DIM                 # 256
OUT_FLAT = DEC_CH[-1] * INPUT_DIM * INPUT_DIM               # 256

_NEG_SLOPE = 0.2
_VAR_MIN = 1e-6


def _round_up(x, m):
    return (x + m - 1) // m * m


# ------------------------------ fused kernel ------------------------------- #

def _dense(a, t_ref, b_ref, act=None):
    """act(a @ T + b): bf16 MXU inputs, f32 accumulation, fused epilogue."""
    acc = jnp.dot(a.astype(jnp.bfloat16), t_ref[...],
                  preferred_element_type=jnp.float32)
    acc = acc + b_ref[...]                          # (1, N) broadcast over rows
    if act == "leaky":
        acc = jnp.maximum(acc, _NEG_SLOPE * acc)    # LeakyReLU(0.2), select-free
    elif act == "clamp":
        acc = jnp.maximum(acc, _VAR_MIN)            # torch.clamp(min=1e-6)
    return acc


def _vae_fused_kernel(x_ref, eps_ref,
                      te1, be1, te2, be2, te3, be3,
                      th, bh,
                      td0, bd0, td2, bd2, td3, bd3,
                      recon_ref, mean_ref, var_ref):
    # ---- encoder: 3x (Conv2d k4 s2 p1 + LeakyReLU) as Toeplitz GEMMs ----
    h = x_ref[...]
    h = _dense(h, te1, be1, "leaky")
    h = _dense(h, te2, be2, "leaky")
    h = _dense(h, te3, be3, "leaky")        # == nn.Flatten() output (NCHW order)

    # ---- latent heads: var | mean in ONE GEMM, split at a 128-lane boundary ----
    hm = _dense(h, th, bh)                  # (tm, 2*LAT_PAD)
    var = jnp.maximum(hm[:, :LAT_PAD], _VAR_MIN)
    mean = hm[:, LAT_PAD:]
    var_ref[...] = var
    mean_ref[...] = mean

    # ---- reparameterization (epsilon supplied from outside the kernel) ----
    z = mean + var * eps_ref[...]

    # ---- decoder: (decoder_input Linear ∘ ConvT1) folded, then 2x (ConvT + LeakyReLU) ----
    d = _dense(z, td0, bd0, "leaky")
    d = _dense(d, td2, bd2, "leaky")
    d = _dense(d, td3, bd3, "leaky")
    recon_ref[...] = d


def vae_apply(prep, x, eps):
    """Fused VAE forward.  x: (N, C, H, W) NCHW.  Returns (recon, mean, var)."""
    n = x.shape[0]
    x_flat = x.reshape(n, -1).astype(jnp.float32)       # NCHW flatten == kernel row layout
    eps_pad = jnp.pad(eps.astype(jnp.float32),
                      ((0, 0), (0, LAT_PAD - LAST_HIDDEN)))

    # Batch-row grid: block of 8 for tiny batches, up to 256 rows per block when scaled up.
    tm_rows = min(256, _round_up(n, 8))
    mp = _round_up(n, tm_rows)
    if mp != n:
        x_flat = jnp.pad(x_flat, ((0, mp - n), (0, 0)))
        eps_pad = jnp.pad(eps_pad, ((0, mp - n), (0, 0)))

    weights = prep["weights"]
    grid = (mp // tm_rows,)

    in_specs = [
        pl.BlockSpec((tm_rows, IN_FLAT), lambda i: (i, 0)),
        pl.BlockSpec((tm_rows, LAT_PAD), lambda i: (i, 0)),
    ] + [
        # Constant index_map -> weights fetched once, VMEM-resident across grid steps.
        pl.BlockSpec(w.shape, lambda i: (0, 0)) for w in weights
    ]
    out_specs = (
        pl.BlockSpec((tm_rows, OUT_FLAT), lambda i: (i, 0)),
        pl.BlockSpec((tm_rows, LAT_PAD), lambda i: (i, 0)),
        pl.BlockSpec((tm_rows, LAT_PAD), lambda i: (i, 0)),
    )

    recon_flat, mean, var = pl.pallas_call(
        _vae_fused_kernel,
        out_shape=(
            jax.ShapeDtypeStruct((mp, OUT_FLAT), jnp.float32),
            jax.ShapeDtypeStruct((mp, LAT_PAD), jnp.float32),
            jax.ShapeDtypeStruct((mp, LAT_PAD), jnp.float32),
        ),
        grid=grid,
        in_specs=in_specs,
        out_specs=out_specs,
        compiler_params=pltpu.CompilerParams(dimension_semantics=("parallel",)),
    )(x_flat, eps_pad, *weights)

    recon = recon_flat[:n].reshape(n, DEC_CH[-1], INPUT_DIM, INPUT_DIM)
    return recon, mean[:n, :LAST_HIDDEN], var[:n, :LAST_HIDDEN]


# --------------------- one-time weight lowering (prep) ---------------------- #

def _conv_toeplitz(wt, b, H, W, stride, pad):
    """Conv2d (PyTorch NCHW, weight (Cout,Cin,kH,kW)) as a dense matrix on flat NCHW."""
    wt = np.asarray(wt, np.float32)
    b = np.asarray(b, np.float32)
    Cout, Cin, kH, kW = wt.shape
    Ho = (H + 2 * pad - kH) // stride + 1
    Wo = (W + 2 * pad - kW) // stride + 1
    co, ci, i, j, ho, wo = np.meshgrid(
        np.arange(Cout), np.arange(Cin), np.arange(kH), np.arange(kW),
        np.arange(Ho), np.arange(Wo), indexing="ij")
    h = stride * ho - pad + i
    w_ = stride * wo - pad + j
    valid = (h >= 0) & (h < H) & (w_ >= 0) & (w_ < W)
    rows = ((ci * H + h) * W + w_)[valid]
    cols = ((co * Ho + ho) * Wo + wo)[valid]
    widx = (((co * Cin + ci) * kH + i) * kW + j)[valid]
    T = np.zeros((Cin * H * W, Cout * Ho * Wo), np.float32)
    np.add.at(T, (rows, cols), wt.reshape(-1)[widx])
    b_exp = np.repeat(b, Ho * Wo)[None, :]
    return T, b_exp, Ho, Wo


def _convT_toeplitz(wt, b, H, W, stride, pad):
    """ConvTranspose2d (PyTorch, weight (Cin,Cout,kH,kW)) as a dense matrix on flat NCHW."""
    wt = np.asarray(wt, np.float32)
    b = np.asarray(b, np.float32)
    Cin, Cout, kH, kW = wt.shape
    Ho = (H - 1) * stride - 2 * pad + kH
    Wo = (W - 1) * stride - 2 * pad + kW
    ci, co, i, j, h, w_ = np.meshgrid(
        np.arange(Cin), np.arange(Cout), np.arange(kH), np.arange(kW),
        np.arange(H), np.arange(W), indexing="ij")
    ho = stride * h - pad + i
    wo = stride * w_ - pad + j
    valid = (ho >= 0) & (ho < Ho) & (wo >= 0) & (wo < Wo)
    rows = ((ci * H + h) * W + w_)[valid]
    cols = ((co * Ho + ho) * Wo + wo)[valid]
    widx = (((ci * Cout + co) * kH + i) * kW + j)[valid]
    T = np.zeros((Cin * H * W, Cout * Ho * Wo), np.float32)
    np.add.at(T, (rows, cols), wt.reshape(-1)[widx])
    b_exp = np.repeat(b, Ho * Wo)[None, :]
    return T, b_exp, Ho, Wo


def prepare_params(params):
    """Lower PyTorch-layout weights ONCE into MXU-ready bf16 matrices (off the hot path)."""
    pairs = []

    # encoder convs
    h = w = INPUT_DIM
    for wt, b in params["enc"]:
        t, bexp, h, w = _conv_toeplitz(wt, b, h, w, stride=2, pad=1)
        pairs.append((t, bexp))

    # var | mean heads, each zero-padded from 32 -> 128 lanes, fused into one GEMM
    def pad_head(wname, bname):
        W = np.asarray(params[wname], np.float32).T           # (FLAT_DIM, LAST_HIDDEN)
        b = np.asarray(params[bname], np.float32)
        Wp = np.zeros((FLAT_DIM, LAT_PAD), np.float32)
        Wp[:, :LAST_HIDDEN] = W
        bp = np.zeros((LAT_PAD,), np.float32)
        bp[:LAST_HIDDEN] = b
        return Wp, bp

    tv, bv = pad_head("var_w", "var_b")
    tme, bme = pad_head("mean_w", "mean_b")
    pairs.append((np.concatenate([tv, tme], axis=1),
                  np.concatenate([bv, bme])[None, :]))

    # decoder_input Linear (padded latent rows), folded into the first ConvTranspose
    # (legal: no activation between them in the original module).
    Wdi = np.asarray(params["dec_in_w"], np.float32).T        # (LAST_HIDDEN, FLAT_DIM)
    bdi = np.asarray(params["dec_in_b"], np.float32)[None, :] # (1, FLAT_DIM)
    Wdi_pad = np.zeros((LAT_PAD, FLAT_DIM), np.float32)
    Wdi_pad[:LAST_HIDDEN] = Wdi

    h = w = DEC_SPATIAL
    for idx, (wt, b) in enumerate(params["dec"]):
        t, bexp, h, w = _convT_toeplitz(wt, b, h, w, stride=2, pad=1)
        if idx == 0:
            bexp = bdi @ t + bexp          # fold decoder_input bias through ConvT1
            t = Wdi_pad @ t                # fold decoder_input weight into ConvT1
        pairs.append((t, bexp))

    ws = []
    for T, b in pairs:
        ws += [jnp.asarray(T, jnp.bfloat16), jnp.asarray(b, jnp.float32)]
    return {"weights": tuple(ws)}


# ------------------------------ initialization ------------------------------ #

def _uniform(key, shape, bound):
    return jax.random.uniform(key, shape, jnp.float32, -bound, bound)


def init_params(key):
    params = {"enc": [], "dec": []}
    keys = iter(jax.random.split(key, 64))
    for i in range(len(ENC_CH) - 1):
        cin, cout = ENC_CH[i], ENC_CH[i + 1]
        bound = 1.0 / (cin * 16) ** 0.5
        params["enc"].append((_uniform(next(keys), (cout, cin, 4, 4), bound),
                              _uniform(next(keys), (cout,), bound)))
    for name, out_f, in_f in (("mean", LAST_HIDDEN, FLAT_DIM),
                              ("var", LAST_HIDDEN, FLAT_DIM),
                              ("dec_in", FLAT_DIM, LAST_HIDDEN)):
        bound = 1.0 / in_f ** 0.5
        params[name + "_w"] = _uniform(next(keys), (out_f, in_f), bound)
        params[name + "_b"] = _uniform(next(keys), (out_f,), bound)
    for i in range(len(DEC_CH) - 1):
        cin, cout = DEC_CH[i], DEC_CH[i + 1]
        bound = 1.0 / (cin * 16) ** 0.5
        params["dec"].append((_uniform(next(keys), (cin, cout, 4, 4), bound),
                              _uniform(next(keys), (cout,), bound)))
    return params


# --------------------------- pure-JAX reference ----------------------------- #

def vae_reference(prep, x, eps):
    """f32 reference using the same lowered matrices (tolerance check only)."""
    ws = prep["weights"]

    def dense(a, t, b, act=None):
        y = a @ t.astype(jnp.float32) + b
        if act == "leaky":
            y = jnp.where(y >= 0, y, _NEG_SLOPE * y)
        return y

    n = x.shape[0]
    h = x.reshape(n, -1).astype(jnp.float32)
    h = dense(h, ws[0], ws[1], "leaky")
    h = dense(h, ws[2], ws[3], "leaky")
    h = dense(h, ws[4], ws[5], "leaky")
    hm = dense(h, ws[6], ws[7])
    var = jnp.maximum(hm[:, :LAT_PAD], _VAR_MIN)
    mean = hm[:, LAT_PAD:]
    eps_pad = jnp.pad(eps.astype(jnp.float32), ((0, 0), (0, LAT_PAD - LAST_HIDDEN)))
    z = mean + var * eps_pad
    d = dense(z, ws[8], ws[9], "leaky")
    d = dense(d, ws[10], ws[11], "leaky")
    d = dense(d, ws[12], ws[13], "leaky")
    return (d.reshape(n, DEC_CH[-1], INPUT_DIM, INPUT_DIM),
            mean[:, :LAST_HIDDEN], var[:, :LAST_HIDDEN])


# ---------------------------------- main ------------------------------------ #

if __name__ == "__main__":
    root = jax.random.PRNGKey(0)
    k_param, k_data, k_eps = jax.random.split(root, 3)

    params = init_params(k_param)
    prep = prepare_params(params)              # one-time weight lowering, not per-step

    x = jax.random.normal(k_data, (2, ENC_CH[0], INPUT_DIM, INPUT_DIM), jnp.float32)
    # TODO(synk): torch.distributions.Normal(0,1).sample() replaced by jax.random.normal glue.
    eps = jax.random.normal(k_eps, (2, LAST_HIDDEN), jnp.float32)

    fwd = jax.jit(vae_apply)
    recon, mean, var = fwd(prep, x, eps)
    jax.block_until_ready((recon, mean, var))

    assert recon.shape == (2, DEC_CH[-1], INPUT_DIM, INPUT_DIM), recon.shape
    assert mean.shape == (2, LAST_HIDDEN), mean.shape
    assert var.shape == (2, LAST_HIDDEN), var.shape
    assert bool(jnp.all(var >= _VAR_MIN)), "var clamp violated"

    r_ref, m_ref, v_ref = vae_reference(prep, x, eps)
    for got, ref, nm in ((recon, r_ref, "recon"), (mean, m_ref, "mean"), (var, v_ref, "var")):
        err = float(jnp.max(jnp.abs(got - ref)))
        assert err < 0.1, f"{nm} mismatch vs f32 reference: max abs err {err}"

    print("KERNEL_OK")
</pallas_src>

<mosaic_0001>
module attributes {stable_mosaic.version = 11 : i64} {
  func.func @_vae_fused_kernel(%arg0: i32, %arg1: memref<8x256xf32, #tpu.memory_space<vmem>>, %arg2: memref<8x128xf32, #tpu.memory_space<vmem>>, %arg3: memref<256x512xbf16, #tpu.memory_space<vmem>>, %arg4: memref<1x512xf32, #tpu.memory_space<vmem>>, %arg5: memref<512x256xbf16, #tpu.memory_space<vmem>>, %arg6: memref<1x256xf32, #tpu.memory_space<vmem>>, %arg7: memref<256x128xbf16, #tpu.memory_space<vmem>>, %arg8: memref<1x128xf32, #tpu.memory_space<vmem>>, %arg9: memref<128x256xbf16, #tpu.memory_space<vmem>>, %arg10: memref<1x256xf32, #tpu.memory_space<vmem>>, %arg11: memref<128x256xbf16, #tpu.memory_space<vmem>>, %arg12: memref<1x256xf32, #tpu.memory_space<vmem>>, %arg13: memref<256x512xbf16, #tpu.memory_space<vmem>>, %arg14: memref<1x512xf32, #tpu.memory_space<vmem>>, %arg15: memref<512x256xbf16, #tpu.memory_space<vmem>>, %arg16: memref<1x256xf32, #tpu.memory_space<vmem>>, %arg17: memref<8x256xf32, #tpu.memory_space<vmem>>, %arg18: memref<8x128xf32, #tpu.memory_space<vmem>>, %arg19: memref<8x128xf32, #tpu.memory_space<vmem>>) attributes {dimension_semantics = [#tpu.dimension_semantics<parallel>], iteration_bounds = array<i64: 1>, scalar_prefetch = 0 : i64, scratch_operands = 0 : i64, tpu.core_type = #tpu.core_type<tc>, window_params = [{transform_indices = @transform_0, window_bounds = array<i64: 8, 256>}, {transform_indices = @transform_1, window_bounds = array<i64: 8, 128>}, {pipeline_mode = #tpu.pipeline_mode<synchronous>, transform_indices = @transform_2, window_bounds = array<i64: 256, 512>}, {pipeline_mode = #tpu.pipeline_mode<synchronous>, transform_indices = @transform_3, window_bounds = array<i64: 1, 512>}, {pipeline_mode = #tpu.pipeline_mode<synchronous>, transform_indices = @transform_4, window_bounds = array<i64: 512, 256>}, {pipeline_mode = #tpu.pipeline_mode<synchronous>, transform_indices = @transform_5, window_bounds = array<i64: 1, 256>}, {pipeline_mode = #tpu.pipeline_mode<synchronous>, transform_indices = @transform_6, window_bounds = array<i64: 256, 128>}, {pipeline_mode = #tpu.pipeline_mode<synchronous>, transform_indices = @transform_7, window_bounds = array<i64: 1, 128>}, {pipeline_mode = #tpu.pipeline_mode<synchronous>, transform_indices = @transform_8, window_bounds = array<i64: 128, 256>}, {pipeline_mode = #tpu.pipeline_mode<synchronous>, transform_indices = @transform_9, window_bounds = array<i64: 1, 256>}, {pipeline_mode = #tpu.pipeline_mode<synchronous>, transform_indices = @transform_10, window_bounds = array<i64: 128, 256>}, {pipeline_mode = #tpu.pipeline_mode<synchronous>, transform_indices = @transform_11, window_bounds = array<i64: 1, 256>}, {pipeline_mode = #tpu.pipeline_mode<synchronous>, transform_indices = @transform_12, window_bounds = array<i64: 256, 512>}, {pipeline_mode = #tpu.pipeline_mode<synchronous>, transform_indices = @transform_13, window_bounds = array<i64: 1, 512>}, {pipeline_mode = #tpu.pipeline_mode<synchronous>, transform_indices = @transform_14, window_bounds = array<i64: 512, 256>}, {pipeline_mode = #tpu.pipeline_mode<synchronous>, transform_indices = @transform_15, window_bounds = array<i64: 1, 256>}, {transform_indices = @transform_16, window_bounds = array<i64: 8, 256>}, {transform_indices = @transform_17, window_bounds = array<i64: 8, 128>}, {transform_indices = @transform_18, window_bounds = array<i64: 8, 128>}]} {
    %c0 = arith.constant 0 : index
    %c0_0 = arith.constant 0 : index
    %0 = vector.load %arg1[%c0, %c0_0] : memref<8x256xf32, #tpu.memory_space<vmem>>, vector<8x256xf32>
    %1 = arith.truncf %0 : vector<8x256xf32> to vector<8x256xbf16>
    %c0_1 = arith.constant 0 : index
    %c0_2 = arith.constant 0 : index
    %2 = vector.load %arg3[%c0_1, %c0_2] : memref<256x512xbf16, #tpu.memory_space<vmem>>, vector<256x512xbf16>
    %cst = arith.constant dense<0.000000e+00> : vector<8x512xf32>
    %3 = tpu.matmul %1, %2, %cst {dimension_numbers = #tpu.dot_dimension_numbers<[1], [0], [0], [1], [0, 0, 1, 1], [], []>} : vector<8x256xbf16>, vector<256x512xbf16>, vector<8x512xf32> -> vector<8x512xf32>
    %c0_3 = arith.constant 0 : index
    %c0_4 = arith.constant 0 : index
    %4 = vector.load %arg4[%c0_3, %c0_4] : memref<1x512xf32, #tpu.memory_space<vmem>>, vector<1x512xf32>
    %5 = vector.broadcast %4 : vector<1x512xf32> to vector<8x512xf32>
    %6 = arith.addf %3, %5 : vector<8x512xf32>
    %cst_5 = arith.constant 2.000000e-01 : f32
    %7 = vector.broadcast %cst_5 : f32 to vector<8x512xf32>
    %8 = arith.mulf %7, %6 : vector<8x512xf32>
    %9 = arith.maximumf %6, %8 : vector<8x512xf32>
    %10 = arith.truncf %9 : vector<8x512xf32> to vector<8x512xbf16>
    %c0_6 = arith.constant 0 : index
    %c0_7 = arith.constant 0 : index
    %11 = vector.load %arg5[%c0_6, %c0_7] : memref<512x256xbf16, #tpu.memory_space<vmem>>, vector<512x256xbf16>
    %cst_8 = arith.constant dense<0.000000e+00> : vector<8x256xf32>
    %12 = tpu.matmul %10, %11, %cst_8 {dimension_numbers = #tpu.dot_dimension_numbers<[1], [0], [0], [1], [0, 0, 1, 1], [], []>} : vector<8x512xbf16>, vector<512x256xbf16>, vector<8x256xf32> -> vector<8x256xf32>
    %c0_9 = arith.constant 0 : index
    %c0_10 = arith.constant 0 : index
    %13 = vector.load %arg6[%c0_9, %c0_10] : memref<1x256xf32, #tpu.memory_space<vmem>>, vector<1x256xf32>
    %14 = vector.broadcast %13 : vector<1x256xf32> to vector<8x256xf32>
    %15 = arith.addf %12, %14 : vector<8x256xf32>
    %cst_11 = arith.constant 2.000000e-01 : f32
    %16 = vector.broadcast %cst_11 : f32 to vector<8x256xf32>
    %17 = arith.mulf %16, %15 : vector<8x256xf32>
    %18 = arith.maximumf %15, %17 : vector<8x256xf32>
    %19 = arith.truncf %18 : vector<8x256xf32> to vector<8x256xbf16>
    %c0_12 = arith.constant 0 : index
    %c0_13 = arith.constant 0 : index
    %20 = vector.load %arg7[%c0_12, %c0_13] : memref<256x128xbf16, #tpu.memory_space<vmem>>, vector<256x128xbf16>
    %cst_14 = arith.constant dense<0.000000e+00> : vector<8x128xf32>
    %21 = tpu.matmul %19, %20, %cst_14 {dimension_numbers = #tpu.dot_dimension_numbers<[1], [0], [0], [1], [0, 0, 1, 1], [], []>} : vector<8x256xbf16>, vector<256x128xbf16>, vector<8x128xf32> -> vector<8x128xf32>
    %c0_15 = arith.constant 0 : index
    %c0_16 = arith.constant 0 : index
    %22 = vector.load %arg8[%c0_15, %c0_16] : memref<1x128xf32, #tpu.memory_space<vmem>>, vector<1x128xf32>
    %23 = vector.broadcast %22 : vector<1x128xf32> to vector<8x128xf32>
    %24 = arith.addf %21, %23 : vector<8x128xf32>
    %cst_17 = arith.constant 2.000000e-01 : f32
    %25 = vector.broadcast %cst_17 : f32 to vector<8x128xf32>
    %26 = arith.mulf %25, %24 : vector<8x128xf32>
    %27 = arith.maximumf %24, %26 : vector<8x128xf32>
    %28 = arith.truncf %27 : vector<8x128xf32> to vector<8x128xbf16>
    %c0_18 = arith.constant 0 : index
    %c0_19 = arith.constant 0 : index
    %29 = vector.load %arg9[%c0_18, %c0_19] : memref<128x256xbf16, #tpu.memory_space<vmem>>, vector<128x256xbf16>
    %cst_20 = arith.constant dense<0.000000e+00> : vector<8x256xf32>
    %30 = tpu.matmul %28, %29, %cst_20 {dimension_numbers = #tpu.dot_dimension_numbers<[1], [0], [0], [1], [0, 0, 1, 1], [], []>} : vector<8x128xbf16>, vector<128x256xbf16>, vector<8x256xf32> -> vector<8x256xf32>
    %c0_21 = arith.constant 0 : index
    %c0_22 = arith.constant 0 : index
    %31 = vector.load %arg10[%c0_21, %c0_22] : memref<1x256xf32, #tpu.memory_space<vmem>>, vector<1x256xf32>
    %32 = vector.broadcast %31 : vector<1x256xf32> to vector<8x256xf32>
    %33 = arith.addf %30, %32 : vector<8x256xf32>
    %34 = vector.extract_strided_slice %33 {offsets = [0, 0], sizes = [8, 128], strides = [1, 1]} : vector<8x256xf32> to vector<8x128xf32>
    %cst_23 = arith.constant 9.99999997E-7 : f32
    %35 = vector.broadcast %cst_23 : f32 to vector<8x128xf32>
    %36 = arith.maximumf %34, %35 : vector<8x128xf32>
    %37 = vector.extract_strided_slice %33 {offsets = [0, 128], sizes = [8, 128], strides = [1, 1]} : vector<8x256xf32> to vector<8x128xf32>
    %c0_24 = arith.constant 0 : index
    %c0_25 = arith.constant 0 : index
    %38 = vector.load %arg19[%c0_24, %c0_25] : memref<8x128xf32, #tpu.memory_space<vmem>>, vector<8x128xf32>
    tpu.vector_store %arg19[%c0_24, %c0_25], %36 {strides = array<i32>} : memref<8x128xf32, #tpu.memory_space<vmem>>, vector<8x128xf32>,
    %c0_26 = arith.constant 0 : index
    %c0_27 = arith.constant 0 : index
    %39 = vector.load %arg18[%c0_26, %c0_27] : memref<8x128xf32, #tpu.memory_space<vmem>>, vector<8x128xf32>
    tpu.vector_store %arg18[%c0_26, %c0_27], %37 {strides = array<i32>} : memref<8x128xf32, #tpu.memory_space<vmem>>, vector<8x128xf32>,
    %c0_28 = arith.constant 0 : index
    %c0_29 = arith.constant 0 : index
    %40 = vector.load %arg2[%c0_28, %c0_29] : memref<8x128xf32, #tpu.memory_space<vmem>>, vector<8x128xf32>
    %41 = arith.mulf %36, %40 : vector<8x128xf32>
    %42 = arith.addf %37, %41 : vector<8x128xf32>
    %43 = arith.truncf %42 : vector<8x128xf32> to vector<8x128xbf16>
    %c0_30 = arith.constant 0 : index
    %c0_31 = arith.constant 0 : index
    %44 = vector.load %arg11[%c0_30, %c0_31] : memref<128x256xbf16, #tpu.memory_space<vmem>>, vector<128x256xbf16>
    %cst_32 = arith.constant dense<0.000000e+00> : vector<8x256xf32>
    %45 = tpu.matmul %43, %44, %cst_32 {dimension_numbers = #tpu.dot_dimension_numbers<[1], [0], [0], [1], [0, 0, 1, 1], [], []>} : vector<8x128xbf16>, vector<128x256xbf16>, vector<8x256xf32> -> vector<8x256xf32>
    %c0_33 = arith.constant 0 : index
    %c0_34 = arith.constant 0 : index
    %46 = vector.load %arg12[%c0_33, %c0_34] : memref<1x256xf32, #tpu.memory_space<vmem>>, vector<1x256xf32>
    %47 = vector.broadcast %46 : vector<1x256xf32> to vector<8x256xf32>
    %48 = arith.addf %45, %47 : vector<8x256xf32>
    %cst_35 = arith.constant 2.000000e-01 : f32
    %49 = vector.broadcast %cst_35 : f32 to vector<8x256xf32>
    %50 = arith.mulf %49, %48 : vector<8x256xf32>
    %51 = arith.maximumf %48, %50 : vector<8x256xf32>
    %52 = arith.truncf %51 : vector<8x256xf32> to vector<8x256xbf16>
    %c0_36 = arith.constant 0 : index
    %c0_37 = arith.constant 0 : index
    %53 = vector.load %arg13[%c0_36, %c0_37] : memref<256x512xbf16, #tpu.memory_space<vmem>>, vector<256x512xbf16>
    %cst_38 = arith.constant dense<0.000000e+00> : vector<8x512xf32>
    %54 = tpu.matmul %52, %53, %cst_38 {dimension_numbers = #tpu.dot_dimension_numbers<[1], [0], [0], [1], [0, 0, 1, 1], [], []>} : vector<8x256xbf16>, vector<256x512xbf16>, vector<8x512xf32> -> vector<8x512xf32>
    %c0_39 = arith.constant 0 : index
    %c0_40 = arith.constant 0 : index
    %55 = vector.load %arg14[%c0_39, %c0_40] : memref<1x512xf32, #tpu.memory_space<vmem>>, vector<1x512xf32>
    %56 = vector.broadcast %55 : vector<1x512xf32> to vector<8x512xf32>
    %57 = arith.addf %54, %56 : vector<8x512xf32>
    %cst_41 = arith.constant 2.000000e-01 : f32
    %58 = vector.broadcast %cst_41 : f32 to vector<8x512xf32>
    %59 = arith.mulf %58, %57 : vector<8x512xf32>
    %60 = arith.maximumf %57, %59 : vector<8x512xf32>
    %61 = arith.truncf %60 : vector<8x512xf32> to vector<8x512xbf16>
    %c0_42 = arith.constant 0 : index
    %c0_43 = arith.constant 0 : index
    %62 = vector.load %arg15[%c0_42, %c0_43] : memref<512x256xbf16, #tpu.memory_space<vmem>>, vector<512x256xbf16>
    %cst_44 = arith.constant dense<0.000000e+00> : vector<8x256xf32>
    %63 = tpu.matmul %61, %62, %cst_44 {dimension_numbers = #tpu.dot_dimension_numbers<[1], [0], [0], [1], [0, 0, 1, 1], [], []>} : vector<8x512xbf16>, vector<512x256xbf16>, vector<8x256xf32> -> vector<8x256xf32>
    %c0_45 = arith.constant 0 : index
    %c0_46 = arith.constant 0 : index
    %64 = vector.load %arg16[%c0_45, %c0_46] : memref<1x256xf32, #tpu.memory_space<vmem>>, vector<1x256xf32>
    %65 = vector.broadcast %64 : vector<1x256xf32> to vector<8x256xf32>
    %66 = arith.addf %63, %65 : vector<8x256xf32>
    %cst_47 = arith.constant 2.000000e-01 : f32
    %67 = vector.broadcast %cst_47 : f32 to vector<8x256xf32>
    %68 = arith.mulf %67, %66 : vector<8x256xf32>
    %69 = arith.maximumf %66, %68 : vector<8x256xf32>
    %c0_48 = arith.constant 0 : index
    %c0_49 = arith.constant 0 : index
    %70 = vector.load %arg17[%c0_48, %c0_49] : memref<8x256xf32, #tpu.memory_space<vmem>>, vector<8x256xf32>
    tpu.vector_store %arg17[%c0_48, %c0_49], %69 {strides = array<i32>} : memref<8x256xf32, #tpu.memory_space<vmem>>, vector<8x256xf32>,
    return
  }
  func.func @transform_0(%arg0: i32) -> (i32, i32) {
    %c0_i32 = arith.constant 0 : i32
    %c0_i32_0 = arith.constant 0 : i32
    return %arg0, %c0_i32 : i32, i32
  }
  func.func @transform_1(%arg0: i32) -> (i32, i32) {
    %c0_i32 = arith.constant 0 : i32
    %c0_i32_0 = arith.constant 0 : i32
    return %arg0, %c0_i32 : i32, i32
  }
  func.func @transform_2(%arg0: i32) -> (i32, i32) {
    %c0_i32 = arith.constant 0 : i32
    %c0_i32_0 = arith.constant 0 : i32
    %c0_i32_1 = arith.constant 0 : i32
    return %c0_i32, %c0_i32_0 : i32, i32
  }
  func.func @transform_3(%arg0: i32) -> (i32, i32) {
    %c0_i32 = arith.constant 0 : i32
    %c0_i32_0 = arith.constant 0 : i32
    %c0_i32_1 = arith.constant 0 : i32
    return %c0_i32, %c0_i32_0 : i32, i32
  }
  func.func @transform_4(%arg0: i32) -> (i32, i32) {
    %c0_i32 = arith.constant 0 : i32
    %c0_i32_0 = arith.constant 0 : i32
    %c0_i32_1 = arith.constant 0 : i32
    return %c0_i32, %c0_i32_0 : i32, i32
  }
  func.func @transform_5(%arg0: i32) -> (i32, i32) {
    %c0_i32 = arith.constant 0 : i32
    %c0_i32_0 = arith.constant 0 : i32
    %c0_i32_1 = arith.constant 0 : i32
    return %c0_i32, %c0_i32_0 : i32, i32
  }
  func.func @transform_6(%arg0: i32) -> (i32, i32) {
    %c0_i32 = arith.constant 0 : i32
    %c0_i32_0 = arith.constant 0 : i32
    %c0_i32_1 = arith.constant 0 : i32
    return %c0_i32, %c0_i32_0 : i32, i32
  }
  func.func @transform_7(%arg0: i32) -> (i32, i32) {
    %c0_i32 = arith.constant 0 : i32
    %c0_i32_0 = arith.constant 0 : i32
    %c0_i32_1 = arith.constant 0 : i32
    return %c0_i32, %c0_i32_0 : i32, i32
  }
  func.func @transform_8(%arg0: i32) -> (i32, i32) {
    %c0_i32 = arith.constant 0 : i32
    %c0_i32_0 = arith.constant 0 : i32
    %c0_i32_1 = arith.constant 0 : i32
    return %c0_i32, %c0_i32_0 : i32, i32
  }
  func.func @transform_9(%arg0: i32) -> (i32, i32) {
    %c0_i32 = arith.constant 0 : i32
    %c0_i32_0 = arith.constant 0 : i32
    %c0_i32_1 = arith.constant 0 : i32
    return %c0_i32, %c0_i32_0 : i32, i32
  }
  func.func @transform_10(%arg0: i32) -> (i32, i32) {
    %c0_i32 = arith.constant 0 : i32
    %c0_i32_0 = arith.constant 0 : i32
    %c0_i32_1 = arith.constant 0 : i32
    return %c0_i32, %c0_i32_0 : i32, i32
  }
  func.func @transform_11(%arg0: i32) -> (i32, i32) {
    %c0_i32 = arith.constant 0 : i32
    %c0_i32_0 = arith.constant 0 : i32
    %c0_i32_1 = arith.constant 0 : i32
    return %c0_i32, %c0_i32_0 : i32, i32
  }
  func.func @transform_12(%arg0: i32) -> (i32, i32) {
    %c0_i32 = arith.constant 0 : i32
    %c0_i32_0 = arith.constant 0 : i32
    %c0_i32_1 = arith.constant 0 : i32
    return %c0_i32, %c0_i32_0 : i32, i32
  }
  func.func @transform_13(%arg0: i32) -> (i32, i32) {
    %c0_i32 = arith.constant 0 : i32
    %c0_i32_0 = arith.constant 0 : i32
    %c0_i32_1 = arith.constant 0 : i32
    return %c0_i32, %c0_i32_0 : i32, i32
  }
  func.func @transform_14(%arg0: i32) -> (i32, i32) {
    %c0_i32 = arith.constant 0 : i32
    %c0_i32_0 = arith.constant 0 : i32
    %c0_i32_1 = arith.constant 0 : i32
    return %c0_i32, %c0_i32_0 : i32, i32
  }
  func.func @transform_15(%arg0: i32) -> (i32, i32) {
    %c0_i32 = arith.constant 0 : i32
    %c0_i32_0 = arith.constant 0 : i32
    %c0_i32_1 = arith.constant 0 : i32
    return %c0_i32, %c0_i32_0 : i32, i32
  }
  func.func @transform_16(%arg0: i32) -> (i32, i32) {
    %c0_i32 = arith.constant 0 : i32
    %c0_i32_0 = arith.constant 0 : i32
    return %arg0, %c0_i32 : i32, i32
  }
  func.func @transform_17(%arg0: i32) -> (i32, i32) {
    %c0_i32 = arith.constant 0 : i32
    %c0_i32_0 = arith.constant 0 : i32
    return %arg0, %c0_i32 : i32, i32
  }
  func.func @transform_18(%arg0: i32) -> (i32, i32) {
    %c0_i32 = arith.constant 0 : i32
    %c0_i32_0 = arith.constant 0 : i32
    return %arg0, %c0_i32 : i32, i32
  }
}

</mosaic_0001>

<bundles_post_ra>
// kernel: vae_apply.1
= control target key start
LH: loop header
LB: loop body
LE: loop exit
PB: predicated region body
PF: predicated region fallthrough
CT: control target
= control target key end

     0   :  { %s3780_s0 = inlined_call_operand.vmem [shape: f32[8,256], index: 0, kind: input, shape index: {}]   ;;  %s3781_s1 = inlined_call_operand.vmem [shape: f32[8,128], index: 1, kind: input, shape index: {}]   ;;  %s3782_s2 = inlined_call_operand.hbm [shape: bf16[256,512], index: 2, kind: input, shape index: {}]   ;;  %s3783_s3 = inlined_call_operand.vmem [shape: f32[1,512], index: 3, kind: input, shape index: {}]   ;;  %s3784_s4 = inlined_call_operand.hbm [shape: bf16[512,256], index: 4, kind: input, shape index: {}]   ;;  %s3785_s5 = inlined_call_operand.vmem [shape: f32[1,256], index: 5, kind: input, shape index: {}]   ;;  %s3786_s6 = inlined_call_operand.hbm [shape: bf16[256,128], index: 6, kind: input, shape index: {}]   ;;  %s3787_s7 = inlined_call_operand.vmem [shape: f32[1,128], index: 7, kind: input, shape index: {}]   ;;  %s3788_s8 = inlined_call_operand.hbm [shape: bf16[128,256], index: 8, kind: input, shape index: {}]   ;;  %s3789_s9 = inlined_call_operand.vmem [shape: f32[1,256], index: 9, kind: input, shape index: {}]   ;;  %s3790_s10 = inlined_call_operand.hbm [shape: bf16[128,256], index: 10, kind: input, shape index: {}]   ;;  %s3791_s11 = inlined_call_operand.vmem [shape: f32[1,256], index: 11, kind: input, shape index: {}]   ;;  %s3792_s12 = inlined_call_operand.hbm [shape: bf16[256,512], index: 12, kind: input, shape index: {}]   ;;  %s3793_s13 = inlined_call_operand.vmem [shape: f32[1,512], index: 13, kind: input, shape index: {}]   ;;  %s3794_s14 = inlined_call_operand.hbm [shape: bf16[512,256], index: 14, kind: input, shape index: {}]   ;;  %s3795_s15 = inlined_call_operand.vmem [shape: f32[1,256], index: 15, kind: input, shape index: {}]   ;;  %s3796_s16 = inlined_call_operand.vmem [shape: f32[8,256], index: 16, kind: output, shape index: {0}]   ;;  %s3797_s17 = inlined_call_operand.vmem [shape: f32[8,128], index: 17, kind: output, shape index: {1}]   ;;  %s3798_s18 = inlined_call_operand.vmem [shape: f32[8,128], index: 18, kind: output, shape index: {2}]  }
   0x1   :  { %3800 = sst [smem:[#allocation17_spill]] %s3780_s0 }
   0x2   :  { %3801 = sst [smem:[#allocation18_spill]] %s3781_s1 }
   0x3   :  { %3802 = sst [smem:[#allocation19_spill]] %s3782_s2 }
   0x4   :  { %24 = vsyncpa [#allocation3], 0 }
   0x5   :  { %25 = vsyncpa [#allocation5], 0 }
   0x6   :  { %26 = vsyncpa [#allocation8], 0 }
   0x7   :  { %27 = vsyncpa [#allocation11], 0  ;;  %s3566_s27 = smov [#allocation4]  }
   0x8   :  { %s51_s28 = sshll.u32 %s3566_s27, 4  ;;  %s52_s28 = int_to_ptr.vmem [resolvable:$true] %s51_s28 }
   0x9   :  { %s3426_s29 = scalar_lea.vmem %s52_s28, 8192  ;;  %p3431_p1 = scmp.lt.s32.totalorder %s52_s28, %s52_s28 }
   0xa   :  { %p3427_p0 = scmp.ne.s32.totalorder %s52_s28, %s3426_s29  ;;  %p3432_p2 = scmp.lt.s32.totalorder %s3426_s29, %s3426_s29 }
   0xc   :  { %p3433_p3 = por %p3432_p2, %p3431_p1 }
   0xe   :  { %p3434_p4 = pnand %p3433_p3, %p3427_p0 }
  0x10   :  { %3437 = shalt.err (!%p3434_p4)
}
  0x11   :  { %s3567_s30 = smov 128   ;;  %s3568_s0 = smov 8  }
  0x12   :  { %57 = dma.hbm_to_vmem [thread:$0]  %s3784_s4, 8192, %s52_s28, [#allocation5], %s3567_s30, %s3567_s30, %s3568_s0  }
  0x13   :  { %s3569_s20 = smov [#allocation7]  }
  0x14   :  { %s79_s21 = sshll.u32 %s3569_s20, 4  ;;  %s80_s21 = int_to_ptr.vmem [resolvable:$true] %s79_s21 }
  0x15   :  { %s3446_s22 = scalar_lea.vmem %s80_s21, 2048  ;;  %p3451_p6 = scmp.lt.s32.totalorder %s80_s21, %s80_s21 }
  0x16   :  { %p3447_p5 = scmp.ne.s32.totalorder %s80_s21, %s3446_s22  ;;  %p3452_p7 = scmp.lt.s32.totalorder %s3446_s22, %s3446_s22 }
  0x18   :  { %p3453_p8 = por %p3452_p7, %p3451_p6 }
  0x1a   :  { %p3454_p9 = pnand %p3453_p8, %p3447_p5 }
  0x1c   :  { %3457 = shalt.err (!%p3454_p9)
}
  0x1d   :  { %85 = dma.hbm_to_vmem [thread:$0]  %s3788_s8, 2048, %s80_s21, [#allocation8], %s3567_s30, %s3567_s30, %s3568_s0  }
  0x1e   :  { %s3570_s24 = smov [#allocation10]   ;;  %s3571_s4 = smov [#allocation2]  }
  0x1f   :  { %s107_s25 = sshll.u32 %s3570_s24, 4  ;;  %s37_s26 = sshll.u32 %s3571_s4, 4  ;;  %s108_s25 = int_to_ptr.vmem [resolvable:$true] %s107_s25  ;;  %s38_s26 = int_to_ptr.vmem [resolvable:$true] %s37_s26 }
  0x20   :  { %s3466_s27 = scalar_lea.vmem %s108_s25, 8192  ;;  %p3471_p11 = scmp.lt.s32.totalorder %s108_s25, %s108_s25 }
  0x21   :  { %p3467_p10 = scmp.ne.s32.totalorder %s108_s25, %s3466_s27  ;;  %p3472_p12 = scmp.lt.s32.totalorder %s3466_s27, %s3466_s27 }
  0x23   :  { %p3473_p13 = por %p3472_p12, %p3471_p11 }
  0x25   :  { %p3474_p0 = pnand %p3473_p13, %p3467_p10 }
  0x27   :  { %3477 = shalt.err (!%p3474_p0)
}
  0x28   :  { %s3572_s28 = smov 256   ;;  %s3573_s29 = smov 16  }
  0x29   :  { %113 = dma.hbm_to_vmem [thread:$0]  %s3792_s12, 8192, %s108_s25, [#allocation11], %s3572_s28, %s3572_s28, %s3573_s29  }
  0x2a   :  { %s3486_s8 = scalar_lea.vmem %s38_s26, 8192  ;;  %p3491_p2 = scmp.lt.s32.totalorder %s38_s26, %s38_s26 }
  0x2b   :  { %p3487_p1 = scmp.ne.s32.totalorder %s38_s26, %s3486_s8  ;;  %p3492_p3 = scmp.lt.s32.totalorder %s3486_s8, %s3486_s8 }
  0x2d   :  { %p3493_p4 = por %p3492_p3, %p3491_p2 }
  0x2f   :  { %p3494_p5 = pnand %p3493_p4, %p3487_p1 }
  0x31   :  { %3497 = shalt.err (!%p3494_p5)
}
  0x32   :  { %s3803_s22 = sld [smem:[#allocation19_spill]]  ;;  %s3574_s2 = smov [#allocation6]  }
  0x33   :  { %s65_s23 = sshll.u32 %s3574_s2, 4  ;;  %s66_s23 = int_to_ptr.vmem [resolvable:$true] %s65_s23 }
  0x34   :  { %s3506_s24 = scalar_lea.vmem %s66_s23, 2048  ;;  %p3511_p7 = scmp.lt.s32.totalorder %s66_s23, %s66_s23 }
  0x35   :  { %p3507_p6 = scmp.ne.s32.totalorder %s66_s23, %s3506_s24  ;;  %p3512_p8 = scmp.lt.s32.totalorder %s3506_s24, %s3506_s24 }
  0x37   :  { %p3513_p9 = por %p3512_p8, %p3511_p7 }
  0x38   :  { %43 = dma.hbm_to_vmem [thread:$0]  %s3803_s22, 8192, %s38_s26, [#allocation3], %s3572_s28, %s3572_s28, %s3573_s29  }
  0x39   :  { %p3514_p10 = pnand %p3513_p9, %p3507_p6 }
  0x3b   :  { %3517 = shalt.err (!%p3514_p10)
}
  0x3c   :  { %s3575_s12 = smov 64   ;;  %s3576_s25 = smov 4  }
  0x3d   :  { %71 = dma.hbm_to_vmem [thread:$0]  %s3786_s6, 2048, %s66_s23, [#allocation5], %s3575_s12, %s3575_s12, %s3576_s25  }
  0x3e   :  { %s3577_s19 = smov [#allocation9]   ;;  %s3578_s26 = smov [#allocation12]  }
  0x3f   :  { %s93_s1 = sshll.u32 %s3577_s19, 4  ;;  %s121_s28 = sshll.u32 %s3578_s26, 4  ;;  %s94_s1 = int_to_ptr.vmem [resolvable:$true] %s93_s1  ;;  %s122_s28 = int_to_ptr.vmem [resolvable:$true] %s121_s28 }
  0x40   :  { %s3526_s29 = scalar_lea.vmem %s94_s1, 2048  ;;  %p3531_p12 = scmp.lt.s32.totalorder %s94_s1, %s94_s1 }
  0x41   :  { %p3527_p11 = scmp.ne.s32.totalorder %s94_s1, %s3526_s29  ;;  %p3532_p13 = scmp.lt.s32.totalorder %s3526_s29, %s3526_s29 }
  0x43   :  { %p3533_p0 = por %p3532_p13, %p3531_p12 }
  0x45   :  { %p3534_p1 = pnand %p3533_p0, %p3527_p11 }
  0x47   :  { %3537 = shalt.err (!%p3534_p1)
}
  0x48   :  { %99 = dma.hbm_to_vmem [thread:$0]  %s3790_s10, 2048, %s94_s1, [#allocation8], %s3567_s30, %s3567_s30, %s3568_s0  }
  0x49   :  { %s3546_s6 = scalar_lea.vmem %s122_s28, 8192  ;;  %p3551_p3 = scmp.lt.s32.totalorder %s122_s28, %s122_s28 }
  0x4a   :  { %p3547_p2 = scmp.ne.s32.totalorder %s122_s28, %s3546_s6  ;;  %p3552_p4 = scmp.lt.s32.totalorder %s3546_s6, %s3546_s6 }
  0x4c   :  { %p3553_p5 = por %p3552_p4, %p3551_p3 }
  0x4e   :  { %p3554_p6 = pnand %p3553_p5, %p3547_p2 }
  0x50   :  { %3557 = shalt.err (!%p3554_p6)
}
  0x51   :  { %127 = dma.hbm_to_vmem [thread:$0]  %s3794_s14, 8192, %s122_s28, [#allocation11], %s3567_s30, %s3567_s30, %s3568_s0  }
  0x52   :  { %3558 = dma.done.wait [#allocation3], 8192  }
  0x53   :  { %3559 = vsyncadd [#allocation3], 4294959104 }
  0x54   :  { %3560 = dma.done.wait [#allocation5], 10240  }
  0x55   :  { %3561 = vsyncadd [#allocation5], 4294957056 }
  0x56   :  { %3562 = dma.done.wait [#allocation8], 4096  }
  0x57   :  { %3563 = vsyncadd [#allocation8], 4294963200 }
  0x58   :  { %3564 = dma.done.wait [#allocation11], 16384  }
  0x59   :  { %3565 = vsyncadd [#allocation11], 4294950912  ;;  %v2970_v0 = vld [vmem:[#allocation2 + $0xe4] ss:$16 sps:$4 sm:$0xff]   ;;  %v2972_v1 = vld [vmem:[#allocation2 + $0xec] ss:$16 sps:$4 sm:$0xff]  }
  0x5a   :  { %562 = vmatprep.subr.bf16.mxu0 %v2970_v0  ;;  %v2974_v2 = vld [vmem:[#allocation2 + $0xe0] ss:$16 sps:$4 sm:$0xff]   ;;  %v2975_v3 = vld [vmem:[#allocation2 + $0xe8] ss:$16 sps:$4 sm:$0xff]   ;;  %603 = vmatprep.subr.bf16.mxu1 %v2972_v1  ;;  %v2976_v4 = vld [vmem:[#allocation2 + $0xc4] ss:$16 sps:$4 sm:$0xff]  }
  0x5b   :  { %563 = vmatpush1.bf16.msra.mxu0 %v2974_v2  ;;  %604 = vmatpush1.bf16.msra.mxu1 %v2975_v3  ;;  %v2978_v5 = vld [vmem:[#allocation2 + $0xcc] ss:$16 sps:$4 sm:$0xff]   ;;  %v2980_v6 = vld [vmem:[#allocation2 + $0xc0] ss:$16 sps:$4 sm:$0xff]   ;;  %v2981_v7 = vld [vmem:[#allocation2 + $0xc8] ss:$16 sps:$4 sm:$0xff]  }
  0x5c   :  { %564 = vmatprep.subr.bf16.mxu0 %v2976_v4  ;;  %605 = vmatprep.subr.bf16.mxu1 %v2978_v5  ;;  %v2982_v8 = vld [vmem:[#allocation2 + $0xa4] ss:$16 sps:$4 sm:$0xff]   ;;  %v2984_v9 = vld [vmem:[#allocation2 + $0xac] ss:$16 sps:$4 sm:$0xff]   ;;  %v2986_v10 = vld [vmem:[#allocation2 + $0xa0] ss:$16 sps:$4 sm:$0xff]  }
  0x5d   :  { %v2987_v11 = vld [vmem:[#allocation2 + $0xa8] ss:$16 sps:$4 sm:$0xff]   ;;  %v2988_v12 = vld [vmem:[#allocation2 + $0x84] ss:$16 sps:$4 sm:$0xff]   ;;  %v2990_v13 = vld [vmem:[#allocation2 + $0x8c] ss:$16 sps:$4 sm:$0xff]  }
  0x5e   :  { %v2992_v14 = vld [vmem:[#allocation2 + $0x80] ss:$16 sps:$4 sm:$0xff]   ;;  %v2993_v15 = vld [vmem:[#allocation2 + $0x88] ss:$16 sps:$4 sm:$0xff]   ;;  %v2994_v16 = vld [vmem:[#allocation2 + $0x64] ss:$16 sps:$4 sm:$0xff]  }
  0x5f   :  { %565 = vmatpush1.bf16.msra.mxu0 %v2980_v6  ;;  %606 = vmatpush1.bf16.msra.mxu1 %v2981_v7  ;;  %v2996_v17 = vld [vmem:[#allocation2 + $0x6c] ss:$16 sps:$4 sm:$0xff]   ;;  %v2998_v18 = vld [vmem:[#allocation2 + $0x60] ss:$16 sps:$4 sm:$0xff]   ;;  %v2999_v19 = vld [vmem:[#allocation2 + $0x68] ss:$16 sps:$4 sm:$0xff]  }
  0x60   :  { %566 = vmatprep.subr.bf16.mxu0 %v2982_v8  ;;  %607 = vmatprep.subr.bf16.mxu1 %v2984_v9  ;;  %v3000_v20 = vld [vmem:[#allocation2 + $0x44] ss:$16 sps:$4 sm:$0xff]   ;;  %v3002_v21 = vld [vmem:[#allocation2 + $0x4c] ss:$16 sps:$4 sm:$0xff]   ;;  %v3004_v22 = vld [vmem:[#allocation2 + $0x40] ss:$16 sps:$4 sm:$0xff]  }
  0x61   :  { %v3005_v23 = vld [vmem:[#allocation2 + $0x48] ss:$16 sps:$4 sm:$0xff]   ;;  %v3006_v24 = vld [vmem:[#allocation2 + $0x24] ss:$16 sps:$4 sm:$0xff]   ;;  %v3008_v25 = vld [vmem:[#allocation2 + $0x2c] ss:$16 sps:$4 sm:$0xff]  }
  0x62   :  { %v3010_v26 = vld [vmem:[#allocation2 + $0x20] ss:$16 sps:$4 sm:$0xff]   ;;  %v3011_v27 = vld [vmem:[#allocation2 + $0x28] ss:$16 sps:$4 sm:$0xff]   ;;  %v3012_v28 = vld [vmem:[#allocation2 + $0x4] ss:$16 sps:$4 sm:$0xff]  }
  0x63   :  { %567 = vmatpush1.bf16.msra.mxu0 %v2986_v10  ;;  %608 = vmatpush1.bf16.msra.mxu1 %v2987_v11  ;;  %v3014_v29 = vld [vmem:[#allocation2 + $0xc] ss:$16 sps:$4 sm:$0xff]   ;;  %v3016_v30 = vld [vmem:[#allocation2] ss:$16 sps:$4 sm:$0xff]   ;;  %v3017_v31 = vld [vmem:[#allocation2 + $0x8] ss:$16 sps:$4 sm:$0xff]  }
  0x64   :  { %568 = vmatprep.subr.bf16.mxu0 %v2988_v12  ;;  %609 = vmatprep.subr.bf16.mxu1 %v2990_v13  ;;  %v3018_v32 = vld [vmem:[#allocation2 + $0x1e4] ss:$16 sps:$4 sm:$0xff]   ;;  %v3020_v33 = vld [vmem:[#allocation2 + $0x1ec] ss:$16 sps:$4 sm:$0xff]   ;;  %v3022_v34 = vld [vmem:[#allocation2 + $0x1e0] ss:$16 sps:$4 sm:$0xff]  }
  0x65   :  { %v3023_v35 = vld [vmem:[#allocation2 + $0x1e8] ss:$16 sps:$4 sm:$0xff]   ;;  %v3024_v36 = vld [vmem:[#allocation2 + $0x1c4] ss:$16 sps:$4 sm:$0xff]   ;;  %v3026_v37 = vld [vmem:[#allocation2 + $0x1cc] ss:$16 sps:$4 sm:$0xff]  }
  0x66   :  { %v3028_v38 = vld [vmem:[#allocation2 + $0x1c0] ss:$16 sps:$4 sm:$0xff]   ;;  %v3029_v39 = vld [vmem:[#allocation2 + $0x1c8] ss:$16 sps:$4 sm:$0xff]   ;;  %v3030_v40 = vld [vmem:[#allocation2 + $0x1a4] ss:$16 sps:$4 sm:$0xff]  }
  0x67   :  { %569 = vmatpush1.bf16.msra.mxu0 %v2992_v14  ;;  %610 = vmatpush1.bf16.msra.mxu1 %v2993_v15  ;;  %v3032_v41 = vld [vmem:[#allocation2 + $0x1ac] ss:$16 sps:$4 sm:$0xff]   ;;  %v3034_v42 = vld [vmem:[#allocation2 + $0x1a0] ss:$16 sps:$4 sm:$0xff]   ;;  %v3035_v43 = vld [vmem:[#allocation2 + $0x1a8] ss:$16 sps:$4 sm:$0xff]  }
  0x68   :  { %570 = vmatprep.subr.bf16.mxu0 %v2994_v16  ;;  %611 = vmatprep.subr.bf16.mxu1 %v2996_v17  ;;  %v3036_v44 = vld [vmem:[#allocation2 + $0x184] ss:$16 sps:$4 sm:$0xff]   ;;  %v3038_v45 = vld [vmem:[#allocation2 + $0x18c] ss:$16 sps:$4 sm:$0xff]   ;;  %s3804_s30 = sld [smem:[#allocation17_spill]] }
  0x69   :  { %v3040_v48 = vld [vmem:[#allocation2 + $0x180] ss:$16 sps:$4 sm:$0xff]   ;;  %v3041_v49 = vld [vmem:[#allocation2 + $0x188] ss:$16 sps:$4 sm:$0xff]   ;;  %v3042_v50 = vld [vmem:[#allocation2 + $0x164] ss:$16 sps:$4 sm:$0xff]  }
  0x6a   :  { %v3044_v51 = vld [vmem:[#allocation2 + $0x16c] ss:$16 sps:$4 sm:$0xff]   ;;  %v3046_v52 = vld [vmem:[#allocation2 + $0x160] ss:$16 sps:$4 sm:$0xff]   ;;  %v3047_v53 = vld [vmem:[#allocation2 + $0x168] ss:$16 sps:$4 sm:$0xff]  }
  0x6b   :  { %571 = vmatpush1.bf16.msra.mxu0 %v2998_v18  ;;  %612 = vmatpush1.bf16.msra.mxu1 %v2999_v19  ;;  %v3048_v54 = vld [vmem:[#allocation2 + $0x144] ss:$16 sps:$4 sm:$0xff]   ;;  %v3050_v55 = vld [vmem:[#allocation2 + $0x14c] ss:$16 sps:$4 sm:$0xff]   ;;  %v3052_v56 = vld [vmem:[#allocation2 + $0x140] ss:$16 sps:$4 sm:$0xff]  }
  0x6c   :  { %572 = vmatprep.subr.bf16.mxu0 %v3000_v20  ;;  %613 = vmatprep.subr.bf16.mxu1 %v3002_v21  ;;  %v3053_v57 = vld [vmem:[#allocation2 + $0x148] ss:$16 sps:$4 sm:$0xff]   ;;  %v3054_v58 = vld [vmem:[#allocation2 + $0x124] ss:$16 sps:$4 sm:$0xff]   ;;  %v3056_v59 = vld [vmem:[#allocation2 + $0x12c] ss:$16 sps:$4 sm:$0xff]  }
  0x6d   :  { %v3058_v60 = vld [vmem:[#allocation2 + $0x120] ss:$16 sps:$4 sm:$0xff]   ;;  %v3059_v61 = vld [vmem:[#allocation2 + $0x128] ss:$16 sps:$4 sm:$0xff]   ;;  %v3060_v62 = vld [vmem:[#allocation2 + $0x104] ss:$16 sps:$4 sm:$0xff]  }
  0x6e   :  { %v153_v46 = vld [vmem:[%s3804_s30 + $0x8] sm:$0xff]  ;;  %v3064_v0 = vld [vmem:[#allocation2 + $0x100] ss:$16 sps:$4 sm:$0xff]   ;;  %v3068_v3 = vld [vmem:[#allocation4 + $0x74] ss:$8 sps:$4 sm:$0xff]   ;;  %s3805_s1 = sld [smem:[#allocation18_spill]] }
  0x6f   :  { %573 = vmatpush1.bf16.msra.mxu0 %v3004_v22  ;;  %614 = vmatpush1.bf16.msra.mxu1 %v3005_v23  ;;  %v155_v47 = vpack.c.bf16 %v153_v46, %v153_v46  ;;  %v3062_v63 = vld [vmem:[#allocation2 + $0x10c] ss:$16 sps:$4 sm:$0xff]   ;;  %v3065_v1 = vld [vmem:[#allocation2 + $0x108] ss:$16 sps:$4 sm:$0xff]   ;;  %v152_v2 = vld [vmem:[%s3804_s30] sm:$0xff] }
  0x70   :  { %574 = vmatprep.subr.bf16.mxu0 %v3006_v24  ;;  %615 = vmatprep.subr.bf16.mxu1 %v3008_v25  ;;  %v3071_v4 = vld [vmem:[#allocation4 + $0x174] ss:$8 sps:$4 sm:$0xff]   ;;  %v154_v5 = vpack.c.bf16 %v152_v2, %v152_v2  ;;  %v3066_v6 = vld [vmem:[#allocation4 + $0x70] ss:$8 sps:$4 sm:$0xff]   ;;  %v3074_v8 = vld [vmem:[#allocation4 + $0x64] ss:$8 sps:$4 sm:$0xff]  }
  0x71   :  { %594 = vmatprep.mubr.bf16.mxu0 %v155_v47  ;;  %635 = vmatprep.mubr.bf16.mxu1 %v155_v47  ;;  %v3069_v7 = vld [vmem:[#allocation4 + $0x170] ss:$8 sps:$4 sm:$0xff]   ;;  %v3077_v9 = vld [vmem:[#allocation4 + $0x164] ss:$8 sps:$4 sm:$0xff]   ;;  %v3072_v10 = vld [vmem:[#allocation4 + $0x60] ss:$8 sps:$4 sm:$0xff]  }
  0x72   :  { %v3075_v11 = vld [vmem:[#allocation4 + $0x160] ss:$8 sps:$4 sm:$0xff]   ;;  %v3080_v12 = vld [vmem:[#allocation4 + $0x54] ss:$8 sps:$4 sm:$0xff]   ;;  %v3078_v14 = vld [vmem:[#allocation4 + $0x50] ss:$8 sps:$4 sm:$0xff]  }
  0x73   :  { %575 = vmatpush1.bf16.msra.mxu0 %v3010_v26  ;;  %616 = vmatpush1.bf16.msra.mxu1 %v3011_v27  ;;  %v3083_v13 = vld [vmem:[#allocation4 + $0x154] ss:$8 sps:$4 sm:$0xff]   ;;  %v3081_v15 = vld [vmem:[#allocation4 + $0x150] ss:$8 sps:$4 sm:$0xff]   ;;  %v3086_v16 = vld [vmem:[#allocation4 + $0x44] ss:$8 sps:$4 sm:$0xff]  }
  0x74   :  { %576 = vmatprep.subr.bf16.mxu0 %v3012_v28  ;;  %617 = vmatprep.subr.bf16.mxu1 %v3014_v29  ;;  %v3089_v17 = vld [vmem:[#allocation4 + $0x144] ss:$8 sps:$4 sm:$0xff]   ;;  %v3084_v18 = vld [vmem:[#allocation4 + $0x40] ss:$8 sps:$4 sm:$0xff]   ;;  %v3092_v20 = vld [vmem:[#allocation4 + $0x34] ss:$8 sps:$4 sm:$0xff]  }
  0x75   :  { %v3087_v19 = vld [vmem:[#allocation4 + $0x140] ss:$8 sps:$4 sm:$0xff]   ;;  %v3095_v21 = vld [vmem:[#allocation4 + $0x134] ss:$8 sps:$4 sm:$0xff]   ;;  %v3090_v22 = vld [vmem:[#allocation4 + $0x30] ss:$8 sps:$4 sm:$0xff]  }
  0x76   :  { %v3093_v23 = vld [vmem:[#allocation4 + $0x130] ss:$8 sps:$4 sm:$0xff]   ;;  %v3098_v24 = vld [vmem:[#allocation4 + $0x24] ss:$8 sps:$4 sm:$0xff]   ;;  %v3096_v26 = vld [vmem:[#allocation4 + $0x20] ss:$8 sps:$4 sm:$0xff]  }
  0x77   :  { %577 = vmatpush1.bf16.msra.mxu0 %v3016_v30  ;;  %618 = vmatpush1.bf16.msra.mxu1 %v3017_v31  ;;  %v3101_v25 = vld [vmem:[#allocation4 + $0x124] ss:$8 sps:$4 sm:$0xff]   ;;  %v3099_v27 = vld [vmem:[#allocation4 + $0x120] ss:$8 sps:$4 sm:$0xff]   ;;  %v3104_v28 = vld [vmem:[#allocation4 + $0x14] ss:$8 sps:$4 sm:$0xff]  }
  0x78   :  { %578 = vmatprep.subr.bf16.mxu0 %v3018_v32  ;;  %619 = vmatprep.subr.bf16.mxu1 %v3020_v33  ;;  %v3107_v29 = vld [vmem:[#allocation4 + $0x114] ss:$8 sps:$4 sm:$0xff]   ;;  %v3102_v30 = vld [vmem:[#allocation4 + $0x10] ss:$8 sps:$4 sm:$0xff]   ;;  %v3110_v32 = vld [vmem:[#allocation4 + $0x4] ss:$8 sps:$4 sm:$0xff]  }
  0x79   :  { %v3105_v31 = vld [vmem:[#allocation4 + $0x110] ss:$8 sps:$4 sm:$0xff]   ;;  %v3113_v33 = vld [vmem:[#allocation4 + $0x104] ss:$8 sps:$4 sm:$0xff]   ;;  %v3156_v2 = vld [vmem:[#allocation4 + $0x80] ss:$8 sps:$4 sm:$0xff]  }
  0x7a   :  { %v3126_v46 = vld [vmem:[#allocation4 + $0xd0] ss:$8 sps:$4 sm:$0xff]  }
  0x7b   :  { %579 = vmatpush2.bf16.msra.mxu0 %v3022_v34  ;;  %620 = vmatpush2.bf16.msra.mxu1 %v3023_v35  ;;  %v3108_v34 = vld [vmem:[#allocation4] ss:$8 sps:$4 sm:$0xff]   ;;  %v3129_v47 = vld [vmem:[#allocation4 + $0x1d0] ss:$8 sps:$4 sm:$0xff]  }
  0x7c   :  { %580 = vmatprep.subr.bf16.mxu0 %v3024_v36  ;;  %621 = vmatprep.subr.bf16.mxu1 %v3026_v37  ;;  %v3111_v35 = vld [vmem:[#allocation4 + $0x100] ss:$8 sps:$4 sm:$0xff]   ;;  %v3116_v36 = vld [vmem:[#allocation4 + $0xf4] ss:$8 sps:$4 sm:$0xff]  }
  0x7d   :  { %v3119_v37 = vld [vmem:[#allocation4 + $0x1f4] ss:$8 sps:$4 sm:$0xff]  }
  0x7f   :  { %581 = vmatpush2.bf16.msra.mxu0 %v3028_v38  ;;  %622 = vmatpush2.bf16.msra.mxu1 %v3029_v39  ;;  %v3114_v38 = vld [vmem:[#allocation4 + $0xf0] ss:$8 sps:$4 sm:$0xff]  }
  0x80   :  { %582 = vmatprep.subr.bf16.mxu0 %v3030_v40  ;;  %623 = vmatprep.subr.bf16.mxu1 %v3032_v41  ;;  %v3117_v39 = vld [vmem:[#allocation4 + $0x1f0] ss:$8 sps:$4 sm:$0xff]   ;;  %v3122_v40 = vld [vmem:[#allocation4 + $0xe4] ss:$8 sps:$4 sm:$0xff]  }
  0x81   :  { %v3125_v41 = vld [vmem:[#allocation4 + $0x1e4] ss:$8 sps:$4 sm:$0xff]  }
  0x83   :  { %583 = vmatpush2.bf16.msra.mxu0 %v3034_v42  ;;  %624 = vmatpush2.bf16.msra.mxu1 %v3035_v43  ;;  %v3120_v42 = vld [vmem:[#allocation4 + $0xe0] ss:$8 sps:$4 sm:$0xff]  }
  0x84   :  { %584 = vmatprep.subr.bf16.mxu0 %v3036_v44  ;;  %625 = vmatprep.subr.bf16.mxu1 %v3038_v45  ;;  %v3123_v43 = vld [vmem:[#allocation4 + $0x1e0] ss:$8 sps:$4 sm:$0xff]   ;;  %v3128_v44 = vld [vmem:[#allocation4 + $0xd4] ss:$8 sps:$4 sm:$0xff]  }
  0x85   :  { %v3131_v45 = vld [vmem:[#allocation4 + $0x1d4] ss:$8 sps:$4 sm:$0xff]  }
  0x87   :  { %585 = vmatpush2.bf16.msra.mxu0 %v3040_v48  ;;  %626 = vmatpush2.bf16.msra.mxu1 %v3041_v49  ;;  %v3134_v48 = vld [vmem:[#allocation4 + $0xc4] ss:$8 sps:$4 sm:$0xff]  }
  0x88   :  { %586 = vmatprep.subr.bf16.mxu0 %v3042_v50  ;;  %627 = vmatprep.subr.bf16.mxu1 %v3044_v51  ;;  %v3137_v49 = vld [vmem:[#allocation4 + $0x1c4] ss:$8 sps:$4 sm:$0xff]   ;;  %v3132_v50 = vld [vmem:[#allocation4 + $0xc0] ss:$8 sps:$4 sm:$0xff]  }
  0x89   :  { %v3135_v51 = vld [vmem:[#allocation4 + $0x1c0] ss:$8 sps:$4 sm:$0xff]  }
  0x8b   :  { %587 = vmatpush2.bf16.msra.mxu0 %v3046_v52  ;;  %628 = vmatpush2.bf16.msra.mxu1 %v3047_v53  ;;  %v3140_v52 = vld [vmem:[#allocation4 + $0xb4] ss:$8 sps:$4 sm:$0xff]  }
  0x8c   :  { %588 = vmatprep.subr.bf16.mxu0 %v3048_v54  ;;  %629 = vmatprep.subr.bf16.mxu1 %v3050_v55  ;;  %v3143_v53 = vld [vmem:[#allocation4 + $0x1b4] ss:$8 sps:$4 sm:$0xff]   ;;  %v3138_v54 = vld [vmem:[#allocation4 + $0xb0] ss:$8 sps:$4 sm:$0xff]  }
  0x8d   :  { %v3141_v55 = vld [vmem:[#allocation4 + $0x1b0] ss:$8 sps:$4 sm:$0xff]  }
  0x8f   :  { %589 = vmatpush2.bf16.msra.mxu0 %v3052_v56  ;;  %630 = vmatpush2.bf16.msra.mxu1 %v3053_v57  ;;  %v3146_v56 = vld [vmem:[#allocation4 + $0xa4] ss:$8 sps:$4 sm:$0xff]  }
  0x90   :  { %590 = vmatprep.subr.bf16.mxu0 %v3054_v58  ;;  %631 = vmatprep.subr.bf16.mxu1 %v3056_v59  ;;  %v3149_v57 = vld [vmem:[#allocation4 + $0x1a4] ss:$8 sps:$4 sm:$0xff]   ;;  %v3144_v58 = vld [vmem:[#allocation4 + $0xa0] ss:$8 sps:$4 sm:$0xff]  }
  0x91   :  { %v3147_v59 = vld [vmem:[#allocation4 + $0x1a0] ss:$8 sps:$4 sm:$0xff]  }
  0x93   :  { %591 = vmatpush2.bf16.msra.mxu0 %v3058_v60  ;;  %632 = vmatpush2.bf16.msra.mxu1 %v3059_v61  ;;  %v3152_v60 = vld [vmem:[#allocation4 + $0x94] ss:$8 sps:$4 sm:$0xff]  }
  0x94   :  { %592 = vmatprep.subr.bf16.mxu0 %v3060_v62  ;;  %633 = vmatprep.subr.bf16.mxu1 %v3062_v63  ;;  %v3155_v61 = vld [vmem:[#allocation4 + $0x194] ss:$8 sps:$4 sm:$0xff]   ;;  %v3150_v62 = vld [vmem:[#allocation4 + $0x90] ss:$8 sps:$4 sm:$0xff]  }
  0x95   :  { %v3153_v63 = vld [vmem:[#allocation4 + $0x190] ss:$8 sps:$4 sm:$0xff]  }
  0x97   :  { %593 = vmatpush2.bf16.msra.mxu0 %v3064_v0  ;;  %634 = vmatpush2.bf16.msra.mxu1 %v3065_v1  ;;  %v3158_v0 = vld [vmem:[#allocation4 + $0x84] ss:$8 sps:$4 sm:$0xff]  }
  0x98   :  { %1052 = vmatprep.subr.bf16.mxu0 %v3068_v3  ;;  %1093 = vmatprep.subr.bf16.mxu1 %v3071_v4  ;;  %v3161_v1 = vld [vmem:[#allocation4 + $0x184] ss:$8 sps:$4 sm:$0xff]   ;;  %v3159_v3 = vld [vmem:[#allocation4 + $0x180] ss:$8 sps:$4 sm:$0xff]   ;;  %v3162_v4 = vld [vmem:[#allocation6 + $0x78] sm:$0xff]  }
  0x9a   :  { %595 = vmatmul.mubr.bf16.vlgmr.msra.gmra.mxu0 %v154_v5  ;;  %636 = vmatmul.mubr.bf16.vlgmr.msra.gmra.mxu1 %v154_v5  ;;  %v222_v5 = vlaneseq }
  0x9b   :  { %1053 = vmatpush1.bf16.msra.mxu0 %v3066_v6  ;;  %1094 = vmatpush1.bf16.msra.mxu1 %v3069_v7 }
  0x9c   :  { %1054 = vmatprep.subr.bf16.mxu0 %v3074_v8  ;;  %1095 = vmatprep.subr.bf16.mxu1 %v3077_v9  ;;  %v3714_v6 = vshrl.u32 %v222_v5, 7  ;;  %v220_v9 = vld [vmem:[%s3783_s3] sm:$0xf] }
  0x9e   :  { %v3717_v7 = vsub.s32 0, %v3714_v6  ;;  %v232_v8 = vsub.s32 2, %v3714_v6 }
  0x9f   :  { %1055 = vmatpush1.bf16.msra.mxu0 %v3072_v10  ;;  %1096 = vmatpush1.bf16.msra.mxu1 %v3075_v11  ;;  %v3724_v10 = vsub.s32 1, %v3714_v6  ;;  %v236_v11 = vsub.s32 3, %v3714_v6 }
  0xa0   :  { %1056 = vmatprep.subr.bf16.mxu0 %v3080_v12  ;;  %1097 = vmatprep.subr.bf16.mxu1 %v3083_v13  ;;  %v225_v12 = vrot.slane %v220_v9, %v3717_v7  ;;  %v233_v13 = vrot.slane %v220_v9, %v232_v8 }
  0xa3   :  { %1057 = vmatpush1.bf16.msra.mxu0 %v3078_v14  ;;  %1098 = vmatpush1.bf16.msra.mxu1 %v3081_v15  ;;  %v229_v14 = vrot.slane %v220_v9, %v3724_v10  ;;  %v237_v15 = vrot.slane %v220_v9, %v236_v11 }
  0xa4   :  { %1058 = vmatprep.subr.bf16.mxu0 %v3086_v16  ;;  %1099 = vmatprep.subr.bf16.mxu1 %v3089_v17 }
  0xa7   :  { %1059 = vmatpush1.bf16.msra.mxu0 %v3084_v18  ;;  %1100 = vmatpush1.bf16.msra.mxu1 %v3087_v19 }
  0xa8   :  { %1060 = vmatprep.subr.bf16.mxu0 %v3092_v20  ;;  %1101 = vmatprep.subr.bf16.mxu1 %v3095_v21 }
  0xab   :  { %1061 = vmatpush1.bf16.msra.mxu0 %v3090_v22  ;;  %1102 = vmatpush1.bf16.msra.mxu1 %v3093_v23 }
  0xac   :  { %1062 = vmatprep.subr.bf16.mxu0 %v3098_v24  ;;  %1103 = vmatprep.subr.bf16.mxu1 %v3101_v25 }
  0xaf   :  { %1063 = vmatpush1.bf16.msra.mxu0 %v3096_v26  ;;  %1104 = vmatpush1.bf16.msra.mxu1 %v3099_v27 }
  0xb0   :  { %1064 = vmatprep.subr.bf16.mxu0 %v3104_v28  ;;  %1105 = vmatprep.subr.bf16.mxu1 %v3107_v29 }
  0xb3   :  { %1065 = vmatpush1.bf16.msra.mxu0 %v3102_v30  ;;  %1106 = vmatpush1.bf16.msra.mxu1 %v3105_v31 }
  0xb4   :  { %1066 = vmatprep.subr.bf16.mxu0 %v3110_v32  ;;  %1107 = vmatprep.subr.bf16.mxu1 %v3113_v33 }
  0xb7   :  { %1067 = vmatpush1.bf16.msra.mxu0 %v3108_v34  ;;  %1108 = vmatpush1.bf16.msra.mxu1 %v3111_v35 }
  0xb8   :  { %1068 = vmatprep.subr.bf16.mxu0 %v3116_v36  ;;  %1109 = vmatprep.subr.bf16.mxu1 %v3119_v37 }
  0xbb   :  { %1069 = vmatpush2.bf16.msra.mxu0 %v3114_v38  ;;  %1110 = vmatpush2.bf16.msra.mxu1 %v3117_v39  ;;  %v3163_v38 = vld [vmem:[#allocation6 + $0x38] sm:$0xff]  }
  0xbc   :  { %1070 = vmatprep.subr.bf16.mxu0 %v3122_v40  ;;  %1111 = vmatprep.subr.bf16.mxu1 %v3125_v41  ;;  %v3164_v41 = vld [vmem:[#allocation6 + $0x70] sm:$0xff]  }
  0xbf   :  { %1071 = vmatpush2.bf16.msra.mxu0 %v3120_v42  ;;  %1112 = vmatpush2.bf16.msra.mxu1 %v3123_v43  ;;  %v3165_v42 = vld [vmem:[#allocation6 + $0x30] sm:$0xff]   ;;  %v3166_v43 = vld [vmem:[#allocation6 + $0x68] sm:$0xff]  }
  0xc0   :  { %1072 = vmatprep.subr.bf16.mxu0 %v3128_v44  ;;  %1113 = vmatprep.subr.bf16.mxu1 %v3131_v45  ;;  %v3167_v44 = vld [vmem:[#allocation6 + $0x28] sm:$0xff]   ;;  %v3168_v45 = vld [vmem:[#allocation6 + $0x60] sm:$0xff]  }
  0xc3   :  { %1073 = vmatpush2.bf16.msra.mxu0 %v3126_v46  ;;  %1114 = vmatpush2.bf16.msra.mxu1 %v3129_v47  ;;  %v3169_v46 = vld [vmem:[#allocation6 + $0x20] sm:$0xff]   ;;  %v3170_v47 = vld [vmem:[#allocation6 + $0x58] sm:$0xff]  }
  0xc4   :  { %1074 = vmatprep.subr.bf16.mxu0 %v3134_v48  ;;  %1115 = vmatprep.subr.bf16.mxu1 %v3137_v49  ;;  %v3171_v48 = vld [vmem:[#allocation6 + $0x18] sm:$0xff]   ;;  %v3172_v49 = vld [vmem:[#allocation6 + $0x50] sm:$0xff]  }
  0xc7   :  { %1075 = vmatpush2.bf16.msra.mxu0 %v3132_v50  ;;  %1116 = vmatpush2.bf16.msra.mxu1 %v3135_v51  ;;  %v3173_v50 = vld [vmem:[#allocation6 + $0x10] sm:$0xff]   ;;  %v3174_v51 = vld [vmem:[#allocation6 + $0x48] sm:$0xff]  }
  0xc8   :  { %1076 = vmatprep.subr.bf16.mxu0 %v3140_v52  ;;  %1117 = vmatprep.subr.bf16.mxu1 %v3143_v53  ;;  %v3175_v52 = vld [vmem:[#allocation6 + $0x8] sm:$0xff]   ;;  %v3176_v53 = vld [vmem:[#allocation6 + $0x40] sm:$0xff]  }
  0xcb   :  { %1077 = vmatpush2.bf16.msra.mxu0 %v3138_v54  ;;  %1118 = vmatpush2.bf16.msra.mxu1 %v3141_v55  ;;  %v3177_v54 = vld [vmem:[#allocation6] sm:$0xff]   ;;  %v3178_v55 = vld [vmem:[#allocation7 + $0x70] ss:$8 sps:$4 sm:$0xff]  }
  0xcc   :  { %1078 = vmatprep.subr.bf16.mxu0 %v3146_v56  ;;  %1119 = vmatprep.subr.bf16.mxu1 %v3149_v57  ;;  %v3180_v56 = vld [vmem:[#allocation7 + $0x74] ss:$8 sps:$4 sm:$0xff]   ;;  %v3183_v57 = vld [vmem:[#allocation7 + $0x64] ss:$8 sps:$4 sm:$0xff]  }
  0xcf   :  { %1079 = vmatpush2.bf16.msra.mxu0 %v3144_v58  ;;  %1120 = vmatpush2.bf16.msra.mxu1 %v3147_v59  ;;  %v3181_v58 = vld [vmem:[#allocation7 + $0x60] ss:$8 sps:$4 sm:$0xff]   ;;  %v3186_v59 = vld [vmem:[#allocation7 + $0x54] ss:$8 sps:$4 sm:$0xff]  }
  0xd0   :  { %1080 = vmatprep.subr.bf16.mxu0 %v3152_v60  ;;  %1121 = vmatprep.subr.bf16.mxu1 %v3155_v61  ;;  %v3184_v60 = vld [vmem:[#allocation7 + $0x50] ss:$8 sps:$4 sm:$0xff]   ;;  %v3189_v61 = vld [vmem:[#allocation7 + $0x44] ss:$8 sps:$4 sm:$0xff]  }
  0xd3   :  { %1081 = vmatpush2.bf16.msra.mxu0 %v3150_v62  ;;  %1122 = vmatpush2.bf16.msra.mxu1 %v3153_v63  ;;  %v3187_v62 = vld [vmem:[#allocation7 + $0x40] ss:$8 sps:$4 sm:$0xff]   ;;  %v3192_v63 = vld [vmem:[#allocation7 + $0x34] ss:$8 sps:$4 sm:$0xff]  }
  0xd4   :  { %1082 = vmatprep.subr.bf16.mxu0 %v3158_v0  ;;  %1123 = vmatprep.subr.bf16.mxu1 %v3161_v1  ;;  %v3190_v0 = vld [vmem:[#allocation7 + $0x30] ss:$8 sps:$4 sm:$0xff]   ;;  %v720_v1 = vld [vmem:[%s3785_s5] sm:$0x3] }
  0xd7   :  { %1083 = vmatpush2.bf16.msra.mxu0 %v3156_v2  ;;  %1124 = vmatpush2.bf16.msra.mxu1 %v3159_v3  ;;  %v725_v2 = vrot.slane %v720_v1, %v3717_v7  ;;  %v729_v3 = vrot.slane %v720_v1, %v3724_v10  ;;  %v3240_v1 = vld [vmem:[#allocation10 + $0xa4] ss:$16 sps:$4 sm:$0xff]  }
  0xd8   :  { %2934 = vmatprep.subr.bf16.mxu0 %v3162_v4  ;;  %1426 = vmatprep.subr.bf16.mxu1 %v3180_v56  ;;  %v3222_v56 = vld [vmem:[#allocation9 + $0x14] ss:$8 sps:$4 sm:$0xff]  }
 0x15a   :  { %v596_v16 = vpop.f32.mrf.mxu0  ;;  %v637_v17 = vpop.f32.mrf.mxu1 }
 0x15b   :  { %v597_v18 = vadd.f32 %v596_v16, %v225_v12  ;;  %v638_v19 = vadd.f32 %v637_v17, %v233_v13 }
 0x15c   :  { %v598_v20 = vpop.f32.mrf.mxu0  ;;  %v639_v21 = vpop.f32.mrf.mxu1 }
 0x15d   :  { %v644_v22 = vmul.f32 0.2, %v597_v18  ;;  %v646_v23 = vmul.f32 0.2, %v638_v19  ;;  %v599_v24 = vadd.f32 %v598_v20, %v229_v14  ;;  %v640_v25 = vadd.f32 %v639_v21, %v237_v15 }
 0x15e   :  { %v600_v26 = vpop.f32.mrf.mxu0  ;;  %v641_v27 = vpop.f32.mrf.mxu1 }
 0x15f   :  { %v645_v28 = vmul.f32 0.2, %v599_v24  ;;  %v647_v29 = vmul.f32 0.2, %v640_v25  ;;  %v648_v30 = vmax.f32 %v597_v18, %v644_v22  ;;  %v650_v31 = vmax.f32 %v638_v19, %v646_v23  ;;  %v3195_v27 = vld [vmem:[#allocation7 + $0x24] ss:$8 sps:$4 sm:$0xff]  }
 0x160   :  { %v601_v32 = vpop.f32.mrf.mxu0  ;;  %v642_v33 = vpop.f32.mrf.mxu1 }
 0x161   :  { %v649_v34 = vmax.f32 %v599_v24, %v645_v28  ;;  %v651_v35 = vmax.f32 %v640_v25, %v647_v29  ;;  %v652_v39 = vpack.c.bf16 %v648_v30, %v648_v30  ;;  %v654_v40 = vpack.c.bf16 %v650_v31, %v650_v31  ;;  %v3193_v28 = vld [vmem:[#allocation7 + $0x20] ss:$8 sps:$4 sm:$0xff]   ;;  %v3198_v29 = vld [vmem:[#allocation7 + $0x14] ss:$8 sps:$4 sm:$0xff]   ;;  %v3196_v30 = vld [vmem:[#allocation7 + $0x10] ss:$8 sps:$4 sm:$0xff]  }
 0x162   :  { %v3201_v31 = vld [vmem:[#allocation7 + $0x4] ss:$8 sps:$4 sm:$0xff]   ;;  %v3199_v32 = vld [vmem:[#allocation7] ss:$8 sps:$4 sm:$0xff]   ;;  %v3579_v33 = vmov 0  }
 0x163   :  { %v653_v36 = vpack.c.bf16 %v649_v34, %v649_v34  ;;  %v655_v37 = vpack.c.bf16 %v651_v35, %v651_v35  ;;  %v3202_v34 = vld [vmem:[#allocation9 + $0x70] ss:$8 sps:$4 sm:$0xff]   ;;  %v3204_v35 = vld [vmem:[#allocation9 + $0x74] ss:$8 sps:$4 sm:$0xff]  }
 0x165   :  { %1084 = vmatprep.mubr.bf16.mxu0 %v653_v36  ;;  %1125 = vmatprep.mubr.bf16.mxu1 %v655_v37  ;;  %v3207_v36 = vld [vmem:[#allocation9 + $0x64] ss:$8 sps:$4 sm:$0xff]   ;;  %v3205_v37 = vld [vmem:[#allocation9 + $0x60] ss:$8 sps:$4 sm:$0xff]  }
 0x166   :  { %1085 = vmatmul.mubr.bf16.vlgmr.msra.gmra.mxu0 %v652_v39  ;;  %1126 = vmatmul.mubr.bf16.vlgmr.msra.gmra.mxu1 %v654_v40  ;;  %v3208_v39 = vld [vmem:[#allocation9 + $0x50] ss:$8 sps:$4 sm:$0xff]   ;;  %v3213_v40 = vld [vmem:[#allocation9 + $0x44] ss:$8 sps:$4 sm:$0xff]  }
 0x167   :  { %2935 = vmatpush3.bf16.msra.mxu0 %v3163_v38  ;;  %1427 = vmatpush1.bf16.msra.mxu1 %v3178_v55  ;;  %v3210_v38 = vld [vmem:[#allocation9 + $0x54] ss:$8 sps:$4 sm:$0xff]  }
 0x168   :  { %2936 = vmatprep.subr.bf16.mxu0 %v3164_v41  ;;  %1428 = vmatprep.subr.bf16.mxu1 %v3183_v57  ;;  %v3211_v41 = vld [vmem:[#allocation9 + $0x40] ss:$8 sps:$4 sm:$0xff]   ;;  %v3220_v57 = vld [vmem:[#allocation9 + $0x10] ss:$8 sps:$4 sm:$0xff]  }
 0x169   :  { %1458 = vmatprep.mubr.bf16.mxu1 %v3579_v33 }
 0x16b   :  { %2937 = vmatpush3.bf16.msra.mxu0 %v3165_v42  ;;  %1429 = vmatpush1.bf16.msra.mxu1 %v3181_v58  ;;  %v3216_v42 = vld [vmem:[#allocation9 + $0x34] ss:$8 sps:$4 sm:$0xff]   ;;  %v3225_v58 = vld [vmem:[#allocation9 + $0x4] ss:$8 sps:$4 sm:$0xff]  }
 0x16c   :  { %2938 = vmatprep.subr.bf16.mxu0 %v3166_v43  ;;  %1430 = vmatprep.subr.bf16.mxu1 %v3186_v59  ;;  %v3214_v43 = vld [vmem:[#allocation9 + $0x30] ss:$8 sps:$4 sm:$0xff]   ;;  %v3223_v59 = vld [vmem:[#allocation9] ss:$8 sps:$4 sm:$0xff]  }
 0x16f   :  { %2939 = vmatpush3.bf16.msra.mxu0 %v3167_v44  ;;  %1431 = vmatpush1.bf16.msra.mxu1 %v3184_v60  ;;  %v3219_v44 = vld [vmem:[#allocation9 + $0x24] ss:$8 sps:$4 sm:$0xff]   ;;  %v3226_v60 = vld [vmem:[#allocation10 + $0xe0] ss:$16 sps:$4 sm:$0xff]  }
 0x170   :  { %2940 = vmatprep.subr.bf16.mxu0 %v3168_v45  ;;  %1432 = vmatprep.subr.bf16.mxu1 %v3189_v61  ;;  %v3217_v45 = vld [vmem:[#allocation9 + $0x20] ss:$8 sps:$4 sm:$0xff]   ;;  %v3228_v61 = vld [vmem:[#allocation10 + $0xe4] ss:$16 sps:$4 sm:$0xff]  }
 0x173   :  { %2941 = vmatpush3.bf16.msra.mxu0 %v3169_v46  ;;  %1433 = vmatpush1.bf16.msra.mxu1 %v3187_v62  ;;  %v3231_v62 = vld [vmem:[#allocation10 + $0xec] ss:$16 sps:$4 sm:$0xff]  }
 0x174   :  { %2942 = vmatprep.subr.bf16.mxu0 %v3170_v47  ;;  %1434 = vmatprep.subr.bf16.mxu1 %v3192_v63  ;;  %v2757_v47 = vld [vmem:[%s3787_s7] ss:$0 sm:$0xff]  ;;  %v3234_v63 = vld [vmem:[#allocation10 + $0xc4] ss:$16 sps:$4 sm:$0xff]  }
 0x177   :  { %2943 = vmatpush3.bf16.msra.mxu0 %v3171_v48  ;;  %1435 = vmatpush1.bf16.msra.mxu1 %v3190_v0  ;;  %v3232_v0 = vld [vmem:[#allocation10 + $0xc0] ss:$16 sps:$4 sm:$0xff]  }
 0x178   :  { %2944 = vmatprep.subr.bf16.mxu0 %v3172_v49  ;;  %1436 = vmatprep.subr.bf16.mxu1 %v3195_v27  ;;  %v3298_v27 = vld [vmem:[#allocation10 + $0x160] ss:$16 sps:$4 sm:$0xff]  }
 0x17b   :  { %2945 = vmatpush3.bf16.msra.mxu0 %v3173_v50  ;;  %1437 = vmatpush1.bf16.msra.mxu1 %v3193_v28  ;;  %v1334_v28 = vld [vmem:[%s3789_s9] sm:$0x3] }
 0x17c   :  { %2946 = vmatprep.subr.bf16.mxu0 %v3174_v51  ;;  %1438 = vmatprep.subr.bf16.mxu1 %v3198_v29  ;;  %v1339_v29 = vrot.slane %v1334_v28, %v3717_v7 }
 0x17f   :  { %2947 = vmatpush3.bf16.msra.mxu0 %v3175_v52  ;;  %1439 = vmatpush1.bf16.msra.mxu1 %v3196_v30  ;;  %v1343_v30 = vrot.slane %v1334_v28, %v3724_v10 }
 0x180   :  { %2948 = vmatprep.subr.bf16.mxu0 %v3176_v53  ;;  %1440 = vmatprep.subr.bf16.mxu1 %v3201_v31 }
 0x183   :  { %2949 = vmatpush3.bf16.msra.mxu0 %v3177_v54  ;;  %1441 = vmatpush1.bf16.msra.mxu1 %v3199_v32 }
 0x184   :  { %1582 = vmatprep.subr.bf16.mxu0 %v3204_v35  ;;  %2035 = vmatprep.subr.bf16.mxu1 %v3228_v61  ;;  %v3291_v61 = vld [vmem:[#allocation10 + $0x1ac] ss:$16 sps:$4 sm:$0xff]  }
 0x226   :  { %v1086_v4 = vpop.f32.mrf.mxu0  ;;  %v1127_v5 = vpop.f32.mrf.mxu1 }
 0x227   :  { %v1087_v9 = vadd.f32 %v1086_v4, %v725_v2  ;;  %v3238_v2 = vld [vmem:[#allocation10 + $0xa0] ss:$16 sps:$4 sm:$0xff]  }
 0x228   :  { %v1088_v12 = vpop.f32.mrf.mxu0  ;;  %v1129_v13 = vpop.f32.mrf.mxu1  ;;  %v3244_v4 = vld [vmem:[#allocation10 + $0x80] ss:$16 sps:$4 sm:$0xff]  }
 0x229   :  { %v1128_v14 = vadd.f32 %v1127_v5, %v1087_v9  ;;  %v1089_v15 = vadd.f32 %v1088_v12, %v729_v3  ;;  %v3246_v3 = vld [vmem:[#allocation10 + $0x84] ss:$16 sps:$4 sm:$0xff]   ;;  %v3250_v9 = vld [vmem:[#allocation10 + $0x60] ss:$16 sps:$4 sm:$0xff]  }
 0x22a   :  { %v1090_v16 = vpop.f32.mrf.mxu0  ;;  %v1131_v17 = vpop.f32.mrf.mxu1  ;;  %v3252_v5 = vld [vmem:[#allocation10 + $0x64] ss:$16 sps:$4 sm:$0xff]  }
 0x22b   :  { %v1134_v18 = vmul.f32 0.2, %v1128_v14  ;;  %v1130_v19 = vadd.f32 %v1129_v13, %v1089_v15  ;;  %v3258_v12 = vld [vmem:[#allocation10 + $0x44] ss:$16 sps:$4 sm:$0xff]   ;;  %v3256_v13 = vld [vmem:[#allocation10 + $0x40] ss:$16 sps:$4 sm:$0xff]  }
 0x22c   :  { %v1091_v20 = vpop.f32.mrf.mxu0  ;;  %v1132_v21 = vpop.f32.mrf.mxu1  ;;  %v3262_v15 = vld [vmem:[#allocation10 + $0x20] ss:$16 sps:$4 sm:$0xff]   ;;  %v3270_v16 = vld [vmem:[#allocation10 + $0x4] ss:$16 sps:$4 sm:$0xff]  }
 0x22d   :  { %v1135_v22 = vmul.f32 0.2, %v1130_v19  ;;  %v1136_v23 = vmax.f32 %v1128_v14, %v1134_v18  ;;  %v3264_v14 = vld [vmem:[#allocation10 + $0x24] ss:$16 sps:$4 sm:$0xff]   ;;  %v3268_v17 = vld [vmem:[#allocation10] ss:$16 sps:$4 sm:$0xff]  }
 0x22e   :  { %v3276_v18 = vld [vmem:[#allocation10 + $0x1e4] ss:$16 sps:$4 sm:$0xff]   ;;  %v3280_v21 = vld [vmem:[#allocation10 + $0x1c0] ss:$16 sps:$4 sm:$0xff]  }
 0x22f   :  { %v1137_v24 = vmax.f32 %v1130_v19, %v1135_v22  ;;  %v1138_v26 = vpack.c.bf16 %v1136_v23, %v1136_v23  ;;  %v3274_v19 = vld [vmem:[#allocation10 + $0x1e0] ss:$16 sps:$4 sm:$0xff]   ;;  %v3282_v20 = vld [vmem:[#allocation10 + $0x1c4] ss:$16 sps:$4 sm:$0xff]  }
 0x230   :  { %v3288_v22 = vld [vmem:[#allocation10 + $0x1a4] ss:$16 sps:$4 sm:$0xff]   ;;  %v3286_v23 = vld [vmem:[#allocation10 + $0x1a0] ss:$16 sps:$4 sm:$0xff]  }
 0x231   :  { %v1139_v25 = vpack.c.bf16 %v1137_v24, %v1137_v24  ;;  %v3294_v24 = vld [vmem:[#allocation10 + $0x184] ss:$16 sps:$4 sm:$0xff]  }
 0x233   :  { %1307 = vmatprep.mubr.bf16.mxu0 %v1139_v25  ;;  %v3292_v25 = vld [vmem:[#allocation10 + $0x180] ss:$16 sps:$4 sm:$0xff]  }
 0x234   :  { %1308 = vmatmul.mubr.bf16.vlgmr.msra.gmra.mxu0 %v1138_v26  ;;  %v3300_v26 = vld [vmem:[#allocation10 + $0x164] ss:$16 sps:$4 sm:$0xff]  }
 0x235   :  { %1614 = vmatprep.mubr.bf16.mxu0 %v3579_v33  ;;  %1583 = vmatpush1.bf16.msra.mxu0 %v3202_v34  ;;  %v1470_v33 = vld [vmem:[%s3805_s1] sm:$0xff] }
 0x236   :  { %1584 = vmatprep.subr.bf16.mxu0 %v3207_v36 }
 0x239   :  { %1585 = vmatpush1.bf16.msra.mxu0 %v3205_v37 }
 0x23a   :  { %1586 = vmatprep.subr.bf16.mxu0 %v3210_v38 }
 0x23d   :  { %1587 = vmatpush1.bf16.msra.mxu0 %v3208_v39 }
 0x23e   :  { %1588 = vmatprep.subr.bf16.mxu0 %v3213_v40 }
 0x241   :  { %1589 = vmatpush1.bf16.msra.mxu0 %v3211_v41  ;;  %v3229_v41 = vld [vmem:[#allocation10 + $0xe8] ss:$16 sps:$4 sm:$0xff]  }
 0x242   :  { %1590 = vmatprep.subr.bf16.mxu0 %v3216_v42 }
 0x245   :  { %1591 = vmatpush1.bf16.msra.mxu0 %v3214_v43  ;;  %v3237_v43 = vld [vmem:[#allocation10 + $0xcc] ss:$16 sps:$4 sm:$0xff]  }
 0x246   :  { %1592 = vmatprep.subr.bf16.mxu0 %v3219_v44  ;;  %v3235_v44 = vld [vmem:[#allocation10 + $0xc8] ss:$16 sps:$4 sm:$0xff]  }
 0x249   :  { %1593 = vmatpush1.bf16.msra.mxu0 %v3217_v45  ;;  %v3243_v45 = vld [vmem:[#allocation10 + $0xac] ss:$16 sps:$4 sm:$0xff]  }
 0x24a   :  { %1594 = vmatprep.subr.bf16.mxu0 %v3222_v56  ;;  %v3271_v56 = vld [vmem:[#allocation10 + $0x8] ss:$16 sps:$4 sm:$0xff]  }
 0x24d   :  { %1595 = vmatpush1.bf16.msra.mxu0 %v3220_v57  ;;  %v3279_v57 = vld [vmem:[#allocation10 + $0x1ec] ss:$16 sps:$4 sm:$0xff]  }
 0x24e   :  { %1596 = vmatprep.subr.bf16.mxu0 %v3225_v58  ;;  %v3277_v58 = vld [vmem:[#allocation10 + $0x1e8] ss:$16 sps:$4 sm:$0xff]  }
 0x251   :  { %1597 = vmatpush1.bf16.msra.mxu0 %v3223_v59  ;;  %v3285_v59 = vld [vmem:[#allocation10 + $0x1cc] ss:$16 sps:$4 sm:$0xff]  }
 0x252   :  { %2076 = vmatprep.subr.bf16.mxu0 %v3231_v62  ;;  %v3289_v62 = vld [vmem:[#allocation10 + $0x1a8] ss:$16 sps:$4 sm:$0xff]  }
 0x2f4   :  { %v2950_v46 = vpop.f32.mrf.mxu0 }
 0x2f6   :  { %v2951_v48 = vpop.f32.mrf.mxu0 }
 0x2f7   :  { %v2952_v49 = vadd.f32 %v2951_v48, %v2950_v46  ;;  %v3241_v46 = vld [vmem:[#allocation10 + $0xa8] ss:$16 sps:$4 sm:$0xff]  }
 0x2f8   :  { %v2953_v50 = vpop.f32.mrf.mxu0  ;;  %v3247_v48 = vld [vmem:[#allocation10 + $0x88] ss:$16 sps:$4 sm:$0xff]  }
 0x2f9   :  { %v1310_v51 = vadd.f32 %v2952_v49, %v2757_v47  ;;  %v3249_v47 = vld [vmem:[#allocation10 + $0x8c] ss:$16 sps:$4 sm:$0xff]   ;;  %v3253_v50 = vld [vmem:[#allocation10 + $0x68] ss:$16 sps:$4 sm:$0xff]  }
 0x2fa   :  { %v2954_v52 = vpop.f32.mrf.mxu0  ;;  %v3255_v49 = vld [vmem:[#allocation10 + $0x6c] ss:$16 sps:$4 sm:$0xff]  }
 0x2fb   :  { %v1315_v53 = vmul.f32 0.2, %v1310_v51  ;;  %v3259_v52 = vld [vmem:[#allocation10 + $0x48] ss:$16 sps:$4 sm:$0xff]  }
 0x2fd   :  { %v1316_v54 = vmax.f32 %v1310_v51, %v1315_v53  ;;  %v3261_v51 = vld [vmem:[#allocation10 + $0x4c] ss:$16 sps:$4 sm:$0xff]  }
 0x2fe   :  { %v3267_v53 = vld [vmem:[#allocation10 + $0x2c] ss:$16 sps:$4 sm:$0xff]  }
 0x2ff   :  { %v1317_v55 = vpack.c.bf16 %v1316_v54, %v1316_v54  ;;  %v3265_v54 = vld [vmem:[#allocation10 + $0x28] ss:$16 sps:$4 sm:$0xff]  }
 0x301   :  { %1459 = vmatmul.mubr.bf16.vlgmr.msra.gmra.mxu1 %v1317_v55  ;;  %v3273_v55 = vld [vmem:[#allocation10 + $0xc] ss:$16 sps:$4 sm:$0xff]  }
 0x302   :  { %2036 = vmatpush1.bf16.msra.mxu1 %v3226_v60  ;;  %v3283_v60 = vld [vmem:[#allocation10 + $0x1c8] ss:$16 sps:$4 sm:$0xff]  }
 0x303   :  { %2037 = vmatprep.subr.bf16.mxu1 %v3234_v63  ;;  %v3297_v63 = vld [vmem:[#allocation10 + $0x18c] ss:$16 sps:$4 sm:$0xff]  }
 0x306   :  { %2038 = vmatpush1.bf16.msra.mxu1 %v3232_v0  ;;  %v3295_v0 = vld [vmem:[#allocation10 + $0x188] ss:$16 sps:$4 sm:$0xff]  }
 0x307   :  { %2039 = vmatprep.subr.bf16.mxu1 %v3240_v1  ;;  %v3303_v1 = vld [vmem:[#allocation10 + $0x16c] ss:$16 sps:$4 sm:$0xff]  }
 0x30a   :  { %2040 = vmatpush1.bf16.msra.mxu1 %v3238_v2  ;;  %v3301_v2 = vld [vmem:[#allocation10 + $0x168] ss:$16 sps:$4 sm:$0xff]  }
 0x30b   :  { %2041 = vmatprep.subr.bf16.mxu1 %v3246_v3  ;;  %v3306_v3 = vld [vmem:[#allocation10 + $0x144] ss:$16 sps:$4 sm:$0xff]  }
 0x30e   :  { %2042 = vmatpush1.bf16.msra.mxu1 %v3244_v4  ;;  %v3309_v4 = vld [vmem:[#allocation10 + $0x14c] ss:$16 sps:$4 sm:$0xff]  }
 0x30f   :  { %2043 = vmatprep.subr.bf16.mxu1 %v3252_v5  ;;  %v3304_v5 = vld [vmem:[#allocation10 + $0x140] ss:$16 sps:$4 sm:$0xff]  }
 0x312   :  { %2044 = vmatpush1.bf16.msra.mxu1 %v3250_v9  ;;  %v3307_v9 = vld [vmem:[#allocation10 + $0x148] ss:$16 sps:$4 sm:$0xff]  }
 0x313   :  { %2045 = vmatprep.subr.bf16.mxu1 %v3258_v12  ;;  %v3312_v12 = vld [vmem:[#allocation10 + $0x124] ss:$16 sps:$4 sm:$0xff]  }
 0x316   :  { %2046 = vmatpush1.bf16.msra.mxu1 %v3256_v13  ;;  %v3315_v13 = vld [vmem:[#allocation10 + $0x12c] ss:$16 sps:$4 sm:$0xff]  }
 0x317   :  { %2047 = vmatprep.subr.bf16.mxu1 %v3264_v14  ;;  %v3310_v14 = vld [vmem:[#allocation10 + $0x120] ss:$16 sps:$4 sm:$0xff]  }
 0x31a   :  { %2048 = vmatpush1.bf16.msra.mxu1 %v3262_v15  ;;  %v3313_v15 = vld [vmem:[#allocation10 + $0x128] ss:$16 sps:$4 sm:$0xff]  }
 0x31b   :  { %2049 = vmatprep.subr.bf16.mxu1 %v3270_v16  ;;  %v3318_v16 = vld [vmem:[#allocation10 + $0x104] ss:$16 sps:$4 sm:$0xff]  }
 0x31e   :  { %2050 = vmatpush1.bf16.msra.mxu1 %v3268_v17  ;;  %v3321_v17 = vld [vmem:[#allocation10 + $0x10c] ss:$16 sps:$4 sm:$0xff]  }
 0x31f   :  { %2051 = vmatprep.subr.bf16.mxu1 %v3276_v18  ;;  %v3316_v18 = vld [vmem:[#allocation10 + $0x100] ss:$16 sps:$4 sm:$0xff]  }
 0x322   :  { %2052 = vmatpush2.bf16.msra.mxu1 %v3274_v19  ;;  %v3319_v19 = vld [vmem:[#allocation10 + $0x108] ss:$16 sps:$4 sm:$0xff]  }
 0x323   :  { %2053 = vmatprep.subr.bf16.mxu1 %v3282_v20  ;;  %v3324_v20 = vld [vmem:[#allocation12 + $0x74] ss:$8 sps:$4 sm:$0xff]  }
 0x326   :  { %2054 = vmatpush2.bf16.msra.mxu1 %v3280_v21  ;;  %v3327_v21 = vld [vmem:[#allocation12 + $0x174] ss:$8 sps:$4 sm:$0xff]  }
 0x327   :  { %2055 = vmatprep.subr.bf16.mxu1 %v3288_v22  ;;  %v1490_v22 = vld [vmem:[%s3791_s11] sm:$0x3] }
 0x32a   :  { %2056 = vmatpush2.bf16.msra.mxu1 %v3286_v23  ;;  %v1495_v23 = vrot.slane %v1490_v22, %v3717_v7 }
 0x32b   :  { %2057 = vmatprep.subr.bf16.mxu1 %v3294_v24  ;;  %v1499_v24 = vrot.slane %v1490_v22, %v3724_v10  ;;  %v3388_v22 = vld [vmem:[#allocation12 + $0xc0] ss:$8 sps:$4 sm:$0xff]  }
 0x32e   :  { %2058 = vmatpush2.bf16.msra.mxu1 %v3292_v25 }
 0x32f   :  { %2059 = vmatprep.subr.bf16.mxu1 %v3300_v26 }
 0x332   :  { %2060 = vmatpush2.bf16.msra.mxu1 %v3298_v27 }
 0x333   :  { %2061 = vmatprep.subr.bf16.mxu1 %v3306_v3  ;;  %v3372_v3 = vld [vmem:[#allocation12 + $0xf4] ss:$8 sps:$4 sm:$0xff]  }
 0x336   :  { %2062 = vmatpush2.bf16.msra.mxu1 %v3304_v5  ;;  %v3370_v5 = vld [vmem:[#allocation12 + $0xf0] ss:$8 sps:$4 sm:$0xff]  }
 0x337   :  { %2063 = vmatprep.subr.bf16.mxu1 %v3312_v12  ;;  %v3378_v12 = vld [vmem:[#allocation12 + $0xe4] ss:$8 sps:$4 sm:$0xff]  }
 0x33a   :  { %2064 = vmatpush2.bf16.msra.mxu1 %v3310_v14  ;;  %v3376_v14 = vld [vmem:[#allocation12 + $0xe0] ss:$8 sps:$4 sm:$0xff]  }
 0x33b   :  { %2065 = vmatprep.subr.bf16.mxu1 %v3318_v16  ;;  %v3384_v16 = vld [vmem:[#allocation12 + $0xd4] ss:$8 sps:$4 sm:$0xff]  }
 0x33e   :  { %2066 = vmatpush2.bf16.msra.mxu1 %v3316_v18  ;;  %v3382_v18 = vld [vmem:[#allocation12 + $0xd0] ss:$8 sps:$4 sm:$0xff]  }
 0x33f   :  { %2525 = vmatprep.subr.bf16.mxu1 %v3324_v20  ;;  %v3390_v20 = vld [vmem:[#allocation12 + $0xc4] ss:$8 sps:$4 sm:$0xff]  }
 0x3c1   :  { %v1460_v31 = vpop.f32.mrf.mxu1 }
 0x3c2   :  { %v1461_v32 = vadd.f32 %v1460_v31, %v1339_v29 }
 0x3c3   :  { %v1462_v34 = vpop.f32.mrf.mxu1 }
 0x3c4   :  { %v1467_v35 = vmax.f32 %v1461_v32, 1e-06  ;;  %v1463_v36 = vadd.f32 %v1462_v34, %v1343_v30 }
 0x3c5   :  { %v1464_v37 = vpop.f32.mrf.mxu1 }
 0x3c6   :  { %1468 = vst [vmem:[%s3798_s18] sm:$0xff] %v1467_v35  ;;  %v1471_v38 = vmul.f32 %v1470_v33, %v1467_v35  ;;  %1469 = vst [vmem:[%s3797_s17] sm:$0xff] %v1463_v36  ;;  %v3325_v37 = vld [vmem:[#allocation12 + $0x170] ss:$8 sps:$4 sm:$0xff]  }
 0x3c7   :  { %v1465_v39 = vpop.f32.mrf.mxu1 }
 0x3c8   :  { %v1472_v40 = vadd.f32 %v1471_v38, %v1463_v36  ;;  %v3322_v36 = vld [vmem:[#allocation12 + $0x70] ss:$8 sps:$4 sm:$0xff]   ;;  %v3330_v39 = vld [vmem:[#allocation12 + $0x64] ss:$8 sps:$4 sm:$0xff]  }
 0x3ca   :  { %v1473_v42 = vpack.c.bf16 %v1472_v40, %v1472_v40  ;;  %v3333_v40 = vld [vmem:[#allocation12 + $0x164] ss:$8 sps:$4 sm:$0xff]  }
 0x3cc   :  { %1615 = vmatmul.mubr.bf16.vlgmr.msra.gmra.mxu0 %v1473_v42  ;;  %v3331_v42 = vld [vmem:[#allocation12 + $0x160] ss:$8 sps:$4 sm:$0xff]  }
 0x3cd   :  { %2077 = vmatpush1.bf16.msra.mxu0 %v3229_v41  ;;  %v3328_v41 = vld [vmem:[#allocation12 + $0x60] ss:$8 sps:$4 sm:$0xff]  }
 0x3ce   :  { %2078 = vmatprep.subr.bf16.mxu0 %v3237_v43  ;;  %v3336_v43 = vld [vmem:[#allocation12 + $0x54] ss:$8 sps:$4 sm:$0xff]  }
 0x3d1   :  { %2079 = vmatpush1.bf16.msra.mxu0 %v3235_v44  ;;  %v3339_v44 = vld [vmem:[#allocation12 + $0x154] ss:$8 sps:$4 sm:$0xff]  }
 0x3d2   :  { %2080 = vmatprep.subr.bf16.mxu0 %v3243_v45  ;;  %v3334_v45 = vld [vmem:[#allocation12 + $0x50] ss:$8 sps:$4 sm:$0xff]  }
 0x3d5   :  { %2081 = vmatpush1.bf16.msra.mxu0 %v3241_v46  ;;  %v3337_v46 = vld [vmem:[#allocation12 + $0x150] ss:$8 sps:$4 sm:$0xff]  }
 0x3d6   :  { %2082 = vmatprep.subr.bf16.mxu0 %v3249_v47  ;;  %v3342_v47 = vld [vmem:[#allocation12 + $0x44] ss:$8 sps:$4 sm:$0xff]  }
 0x3d9   :  { %2083 = vmatpush1.bf16.msra.mxu0 %v3247_v48  ;;  %v3345_v48 = vld [vmem:[#allocation12 + $0x144] ss:$8 sps:$4 sm:$0xff]  }
 0x3da   :  { %2084 = vmatprep.subr.bf16.mxu0 %v3255_v49  ;;  %v3340_v49 = vld [vmem:[#allocation12 + $0x40] ss:$8 sps:$4 sm:$0xff]  }
 0x3dd   :  { %2085 = vmatpush1.bf16.msra.mxu0 %v3253_v50  ;;  %v3343_v50 = vld [vmem:[#allocation12 + $0x140] ss:$8 sps:$4 sm:$0xff]  }
 0x3de   :  { %2086 = vmatprep.subr.bf16.mxu0 %v3261_v51  ;;  %v3348_v51 = vld [vmem:[#allocation12 + $0x34] ss:$8 sps:$4 sm:$0xff]  }
 0x3e1   :  { %2087 = vmatpush1.bf16.msra.mxu0 %v3259_v52  ;;  %v3351_v52 = vld [vmem:[#allocation12 + $0x134] ss:$8 sps:$4 sm:$0xff]  }
 0x3e2   :  { %2088 = vmatprep.subr.bf16.mxu0 %v3267_v53  ;;  %v3346_v53 = vld [vmem:[#allocation12 + $0x30] ss:$8 sps:$4 sm:$0xff]  }
 0x3e5   :  { %2089 = vmatpush1.bf16.msra.mxu0 %v3265_v54  ;;  %v3349_v54 = vld [vmem:[#allocation12 + $0x130] ss:$8 sps:$4 sm:$0xff]  }
 0x3e6   :  { %2090 = vmatprep.subr.bf16.mxu0 %v3273_v55  ;;  %v3354_v55 = vld [vmem:[#allocation12 + $0x24] ss:$8 sps:$4 sm:$0xff]  }
 0x3e9   :  { %2091 = vmatpush1.bf16.msra.mxu0 %v3271_v56  ;;  %v3357_v56 = vld [vmem:[#allocation12 + $0x124] ss:$8 sps:$4 sm:$0xff]  }
 0x3ea   :  { %2092 = vmatprep.subr.bf16.mxu0 %v3279_v57  ;;  %v3352_v57 = vld [vmem:[#allocation12 + $0x20] ss:$8 sps:$4 sm:$0xff]  }
 0x3ed   :  { %2093 = vmatpush2.bf16.msra.mxu0 %v3277_v58  ;;  %v3355_v58 = vld [vmem:[#allocation12 + $0x120] ss:$8 sps:$4 sm:$0xff]  }
 0x3ee   :  { %2094 = vmatprep.subr.bf16.mxu0 %v3285_v59  ;;  %v3360_v59 = vld [vmem:[#allocation12 + $0x14] ss:$8 sps:$4 sm:$0xff]  }
 0x3f1   :  { %2095 = vmatpush2.bf16.msra.mxu0 %v3283_v60  ;;  %v3363_v60 = vld [vmem:[#allocation12 + $0x114] ss:$8 sps:$4 sm:$0xff]  }
 0x3f2   :  { %2096 = vmatprep.subr.bf16.mxu0 %v3291_v61  ;;  %v3358_v61 = vld [vmem:[#allocation12 + $0x10] ss:$8 sps:$4 sm:$0xff]  }
 0x3f5   :  { %2097 = vmatpush2.bf16.msra.mxu0 %v3289_v62  ;;  %v3361_v62 = vld [vmem:[#allocation12 + $0x110] ss:$8 sps:$4 sm:$0xff]  }
 0x3f6   :  { %2098 = vmatprep.subr.bf16.mxu0 %v3297_v63  ;;  %v3366_v63 = vld [vmem:[#allocation12 + $0x4] ss:$8 sps:$4 sm:$0xff]  }
 0x3f9   :  { %2099 = vmatpush2.bf16.msra.mxu0 %v3295_v0  ;;  %v3369_v0 = vld [vmem:[#allocation12 + $0x104] ss:$8 sps:$4 sm:$0xff]  }
 0x3fa   :  { %2100 = vmatprep.subr.bf16.mxu0 %v3303_v1  ;;  %v3364_v1 = vld [vmem:[#allocation12] ss:$8 sps:$4 sm:$0xff]  }
 0x3fd   :  { %2101 = vmatpush2.bf16.msra.mxu0 %v3301_v2  ;;  %v3367_v2 = vld [vmem:[#allocation12 + $0x100] ss:$8 sps:$4 sm:$0xff]  }
 0x3fe   :  { %2102 = vmatprep.subr.bf16.mxu0 %v3309_v4  ;;  %v3375_v4 = vld [vmem:[#allocation12 + $0x1f4] ss:$8 sps:$4 sm:$0xff]  }
 0x401   :  { %2103 = vmatpush2.bf16.msra.mxu0 %v3307_v9  ;;  %v3373_v9 = vld [vmem:[#allocation12 + $0x1f0] ss:$8 sps:$4 sm:$0xff]  }
 0x402   :  { %2104 = vmatprep.subr.bf16.mxu0 %v3315_v13  ;;  %v3381_v13 = vld [vmem:[#allocation12 + $0x1e4] ss:$8 sps:$4 sm:$0xff]  }
 0x405   :  { %2105 = vmatpush2.bf16.msra.mxu0 %v3313_v15  ;;  %v3379_v15 = vld [vmem:[#allocation12 + $0x1e0] ss:$8 sps:$4 sm:$0xff]  }
 0x406   :  { %2106 = vmatprep.subr.bf16.mxu0 %v3321_v17  ;;  %v3387_v17 = vld [vmem:[#allocation12 + $0x1d4] ss:$8 sps:$4 sm:$0xff]  }
 0x409   :  { %2107 = vmatpush2.bf16.msra.mxu0 %v3319_v19  ;;  %v3385_v19 = vld [vmem:[#allocation12 + $0x1d0] ss:$8 sps:$4 sm:$0xff]  }
 0x40a   :  { %2566 = vmatprep.subr.bf16.mxu0 %v3327_v21  ;;  %v3393_v21 = vld [vmem:[#allocation12 + $0x1c4] ss:$8 sps:$4 sm:$0xff]  }
 0x48c   :  { %v1616_v25 = vpop.f32.mrf.mxu0 }
 0x48d   :  { %v1617_v26 = vadd.f32 %v1616_v25, %v1495_v23  ;;  %v3391_v23 = vld [vmem:[#allocation12 + $0x1c0] ss:$8 sps:$4 sm:$0xff]   ;;  %v3399_v25 = vld [vmem:[#allocation12 + $0x1b4] ss:$8 sps:$4 sm:$0xff]  }
 0x48e   :  { %v1618_v27 = vpop.f32.mrf.mxu0 }
 0x48f   :  { %v1623_v28 = vmul.f32 0.2, %v1617_v26  ;;  %v1619_v29 = vadd.f32 %v1618_v27, %v1499_v24  ;;  %v3396_v24 = vld [vmem:[#allocation12 + $0xb4] ss:$8 sps:$4 sm:$0xff]   ;;  %v3397_v27 = vld [vmem:[#allocation12 + $0x1b0] ss:$8 sps:$4 sm:$0xff]  }
 0x490   :  { %v1620_v30 = vpop.f32.mrf.mxu0 }
 0x491   :  { %v1624_v31 = vmul.f32 0.2, %v1619_v29  ;;  %v1625_v32 = vmax.f32 %v1617_v26, %v1623_v28  ;;  %v3394_v26 = vld [vmem:[#allocation12 + $0xb0] ss:$8 sps:$4 sm:$0xff]   ;;  %v3402_v28 = vld [vmem:[#allocation12 + $0xa4] ss:$8 sps:$4 sm:$0xff]  }
 0x492   :  { %v1621_v33 = vpop.f32.mrf.mxu0  ;;  %v3400_v30 = vld [vmem:[#allocation12 + $0xa0] ss:$8 sps:$4 sm:$0xff]  }
 0x493   :  { %v1626_v34 = vmax.f32 %v1619_v29, %v1624_v31  ;;  %v1627_v38 = vpack.c.bf16 %v1625_v32, %v1625_v32  ;;  %v3405_v29 = vld [vmem:[#allocation12 + $0x1a4] ss:$8 sps:$4 sm:$0xff]   ;;  %v3403_v31 = vld [vmem:[#allocation12 + $0x1a0] ss:$8 sps:$4 sm:$0xff]   ;;  %v3408_v32 = vld [vmem:[#allocation12 + $0x94] ss:$8 sps:$4 sm:$0xff]  }
 0x494   :  { %v3411_v33 = vld [vmem:[#allocation12 + $0x194] ss:$8 sps:$4 sm:$0xff]  }
 0x495   :  { %v1628_v35 = vpack.c.bf16 %v1626_v34, %v1626_v34  ;;  %v3406_v34 = vld [vmem:[#allocation12 + $0x90] ss:$8 sps:$4 sm:$0xff]  }
 0x497   :  { %2067 = vmatprep.mubr.bf16.mxu1 %v1628_v35  ;;  %2108 = vmatprep.mubr.bf16.mxu0 %v1628_v35  ;;  %v3409_v35 = vld [vmem:[#allocation12 + $0x190] ss:$8 sps:$4 sm:$0xff]  }
 0x498   :  { %2068 = vmatmul.mubr.bf16.vlgmr.msra.gmra.mxu1 %v1627_v38  ;;  %2109 = vmatmul.mubr.bf16.vlgmr.msra.gmra.mxu0 %v1627_v38  ;;  %v3412_v38 = vld [vmem:[#allocation12 + $0x80] ss:$8 sps:$4 sm:$0xff]  }
 0x499   :  { %2526 = vmatpush1.bf16.msra.mxu1 %v3322_v36  ;;  %2567 = vmatpush1.bf16.msra.mxu0 %v3325_v37  ;;  %v3414_v36 = vld [vmem:[#allocation12 + $0x84] ss:$8 sps:$4 sm:$0xff]  }
 0x49a   :  { %2527 = vmatprep.subr.bf16.mxu1 %v3330_v39  ;;  %2568 = vmatprep.subr.bf16.mxu0 %v3333_v40  ;;  %v3417_v37 = vld [vmem:[#allocation12 + $0x184] ss:$8 sps:$4 sm:$0xff]   ;;  %v3415_v39 = vld [vmem:[#allocation12 + $0x180] ss:$8 sps:$4 sm:$0xff]  }
 0x49b   :  { %v1693_v40 = vld [vmem:[%s3793_s13] sm:$0xf] }
 0x49d   :  { %2528 = vmatpush1.bf16.msra.mxu1 %v3328_v41  ;;  %2569 = vmatpush1.bf16.msra.mxu0 %v3331_v42  ;;  %v1698_v41 = vrot.slane %v1693_v40, %v3717_v7  ;;  %v1706_v42 = vrot.slane %v1693_v40, %v232_v8 }
 0x49e   :  { %2529 = vmatprep.subr.bf16.mxu1 %v3336_v43  ;;  %2570 = vmatprep.subr.bf16.mxu0 %v3339_v44  ;;  %v1702_v43 = vrot.slane %v1693_v40, %v3724_v10  ;;  %v1710_v44 = vrot.slane %v1693_v40, %v236_v11 }
 0x4a1   :  { %2530 = vmatpush1.bf16.msra.mxu1 %v3334_v45  ;;  %2571 = vmatpush1.bf16.msra.mxu0 %v3337_v46 }
 0x4a2   :  { %2531 = vmatprep.subr.bf16.mxu1 %v3342_v47  ;;  %2572 = vmatprep.subr.bf16.mxu0 %v3345_v48 }
 0x4a5   :  { %2532 = vmatpush1.bf16.msra.mxu1 %v3340_v49  ;;  %2573 = vmatpush1.bf16.msra.mxu0 %v3343_v50 }
 0x4a6   :  { %2533 = vmatprep.subr.bf16.mxu1 %v3348_v51  ;;  %2574 = vmatprep.subr.bf16.mxu0 %v3351_v52 }
 0x4a9   :  { %2534 = vmatpush1.bf16.msra.mxu1 %v3346_v53  ;;  %2575 = vmatpush1.bf16.msra.mxu0 %v3349_v54 }
 0x4aa   :  { %2535 = vmatprep.subr.bf16.mxu1 %v3354_v55  ;;  %2576 = vmatprep.subr.bf16.mxu0 %v3357_v56 }
 0x4ad   :  { %2536 = vmatpush1.bf16.msra.mxu1 %v3352_v57  ;;  %2577 = vmatpush1.bf16.msra.mxu0 %v3355_v58 }
 0x4ae   :  { %2537 = vmatprep.subr.bf16.mxu1 %v3360_v59  ;;  %2578 = vmatprep.subr.bf16.mxu0 %v3363_v60 }
 0x4b1   :  { %2538 = vmatpush1.bf16.msra.mxu1 %v3358_v61  ;;  %2579 = vmatpush1.bf16.msra.mxu0 %v3361_v62 }
 0x4b2   :  { %2539 = vmatprep.subr.bf16.mxu1 %v3366_v63  ;;  %2580 = vmatprep.subr.bf16.mxu0 %v3369_v0 }
 0x4b5   :  { %2540 = vmatpush1.bf16.msra.mxu1 %v3364_v1  ;;  %2581 = vmatpush1.bf16.msra.mxu0 %v3367_v2  ;;  %v2193_v2 = vld [vmem:[%s3795_s15] sm:$0x3] }
 0x4b6   :  { %2541 = vmatprep.subr.bf16.mxu1 %v3372_v3  ;;  %2582 = vmatprep.subr.bf16.mxu0 %v3375_v4  ;;  %v2198_v3 = vrot.slane %v2193_v2, %v3717_v7  ;;  %v2202_v4 = vrot.slane %v2193_v2, %v3724_v10 }
 0x4b9   :  { %2542 = vmatpush2.bf16.msra.mxu1 %v3370_v5  ;;  %2583 = vmatpush2.bf16.msra.mxu0 %v3373_v9 }
 0x4ba   :  { %2543 = vmatprep.subr.bf16.mxu1 %v3378_v12  ;;  %2584 = vmatprep.subr.bf16.mxu0 %v3381_v13 }
 0x4bd   :  { %2544 = vmatpush2.bf16.msra.mxu1 %v3376_v14  ;;  %2585 = vmatpush2.bf16.msra.mxu0 %v3379_v15 }
 0x4be   :  { %2545 = vmatprep.subr.bf16.mxu1 %v3384_v16  ;;  %2586 = vmatprep.subr.bf16.mxu0 %v3387_v17 }
 0x4c1   :  { %2546 = vmatpush2.bf16.msra.mxu1 %v3382_v18  ;;  %2587 = vmatpush2.bf16.msra.mxu0 %v3385_v19 }
 0x4c2   :  { %2547 = vmatprep.subr.bf16.mxu1 %v3390_v20  ;;  %2588 = vmatprep.subr.bf16.mxu0 %v3393_v21 }
 0x4c5   :  { %2548 = vmatpush2.bf16.msra.mxu1 %v3388_v22  ;;  %2589 = vmatpush2.bf16.msra.mxu0 %v3391_v23 }
 0x4c6   :  { %2549 = vmatprep.subr.bf16.mxu1 %v3396_v24  ;;  %2590 = vmatprep.subr.bf16.mxu0 %v3399_v25 }
 0x4c9   :  { %2550 = vmatpush2.bf16.msra.mxu1 %v3394_v26  ;;  %2591 = vmatpush2.bf16.msra.mxu0 %v3397_v27 }
 0x4ca   :  { %2551 = vmatprep.subr.bf16.mxu1 %v3402_v28  ;;  %2592 = vmatprep.subr.bf16.mxu0 %v3405_v29 }
 0x4cd   :  { %2552 = vmatpush2.bf16.msra.mxu1 %v3400_v30  ;;  %2593 = vmatpush2.bf16.msra.mxu0 %v3403_v31 }
 0x4ce   :  { %2553 = vmatprep.subr.bf16.mxu1 %v3408_v32  ;;  %2594 = vmatprep.subr.bf16.mxu0 %v3411_v33 }
 0x4d1   :  { %2554 = vmatpush2.bf16.msra.mxu1 %v3406_v34  ;;  %2595 = vmatpush2.bf16.msra.mxu0 %v3409_v35 }
 0x4d2   :  { %2555 = vmatprep.subr.bf16.mxu1 %v3414_v36  ;;  %2596 = vmatprep.subr.bf16.mxu0 %v3417_v37 }
 0x4d5   :  { %2556 = vmatpush2.bf16.msra.mxu1 %v3412_v38  ;;  %2597 = vmatpush2.bf16.msra.mxu0 %v3415_v39 }
 0x558   :  { %v2069_v45 = vpop.f32.mrf.mxu1  ;;  %v2110_v46 = vpop.f32.mrf.mxu0 }
 0x559   :  { %v2070_v47 = vadd.f32 %v2069_v45, %v1698_v41  ;;  %v2111_v48 = vadd.f32 %v2110_v46, %v1706_v42 }
 0x55a   :  { %v2071_v49 = vpop.f32.mrf.mxu1  ;;  %v2112_v50 = vpop.f32.mrf.mxu0 }
 0x55b   :  { %v2117_v51 = vmul.f32 0.2, %v2070_v47  ;;  %v2119_v52 = vmul.f32 0.2, %v2111_v48  ;;  %v2072_v53 = vadd.f32 %v2071_v49, %v1702_v43  ;;  %v2113_v54 = vadd.f32 %v2112_v50, %v1710_v44 }
 0x55c   :  { %v2073_v55 = vpop.f32.mrf.mxu1  ;;  %v2114_v56 = vpop.f32.mrf.mxu0 }
 0x55d   :  { %v2118_v57 = vmul.f32 0.2, %v2072_v53  ;;  %v2120_v58 = vmul.f32 0.2, %v2113_v54  ;;  %v2121_v8 = vmax.f32 %v2070_v47, %v2117_v51  ;;  %v2123_v59 = vmax.f32 %v2111_v48, %v2119_v52 }
 0x55e   :  { %v2074_v60 = vpop.f32.mrf.mxu1  ;;  %v2115_v61 = vpop.f32.mrf.mxu0 }
 0x55f   :  { %v2122_v6 = vmax.f32 %v2072_v53, %v2118_v57  ;;  %v2124_v11 = vmax.f32 %v2113_v54, %v2120_v58  ;;  %v2125_v0 = vpack.c.bf16 %v2121_v8, %v2121_v8  ;;  %v2127_v1 = vpack.c.bf16 %v2123_v59, %v2123_v59 }
 0x561   :  { %v2126_v62 = vpack.c.bf16 %v2122_v6, %v2122_v6  ;;  %v2128_v63 = vpack.c.bf16 %v2124_v11, %v2124_v11 }
 0x563   :  { %2557 = vmatprep.mubr.bf16.mxu1 %v2126_v62  ;;  %2598 = vmatprep.mubr.bf16.mxu0 %v2128_v63 }
 0x564   :  { %2558 = vmatmul.mubr.bf16.vlgmr.msra.gmra.mxu1 %v2125_v0  ;;  %2599 = vmatmul.mubr.bf16.vlgmr.msra.gmra.mxu0 %v2127_v1 }
 0x624   :  { %v2559_v5 = vpop.f32.mrf.mxu1  ;;  %v2600_v9 = vpop.f32.mrf.mxu0 }
 0x625   :  { %v2560_v12 = vadd.f32 %v2559_v5, %v2198_v3 }
 0x626   :  { %v2561_v13 = vpop.f32.mrf.mxu1  ;;  %v2602_v14 = vpop.f32.mrf.mxu0 }
 0x627   :  { %v2601_v15 = vadd.f32 %v2600_v9, %v2560_v12  ;;  %v2562_v16 = vadd.f32 %v2561_v13, %v2202_v4 }
 0x628   :  { %v2563_v17 = vpop.f32.mrf.mxu1  ;;  %v2604_v18 = vpop.f32.mrf.mxu0 }
 0x629   :  { %v2607_v19 = vmul.f32 0.2, %v2601_v15  ;;  %v2603_v20 = vadd.f32 %v2602_v14, %v2562_v16 }
 0x62a   :  { %v2564_v21 = vpop.f32.mrf.mxu1  ;;  %v2605_v22 = vpop.f32.mrf.mxu0 }
 0x62b   :  { %v2609_v23 = vmax.f32 %v2601_v15, %v2607_v19  ;;  %v2608_v24 = vmul.f32 0.2, %v2603_v20 }
 0x62d   :  { %2611 = vst [vmem:[%s3796_s16] sm:$0xff] %v2609_v23  ;;  %v2610_v7 = vmax.f32 %v2603_v20, %v2608_v24 }
 0x62f   :  { %2612 = vst [vmem:[%s3796_s16 + $0x8] sm:$0xff] %v2610_v7 }
 0x630   :  { %2625 = vsyncpa [#allocation3], 1 }
 0x631   :  { %2626 = vsyncpa [#allocation5], 1 }
 0x632   :  { %2627 = vsyncpa [#allocation8], 1 }
 0x633   :  { %2628 = vsyncpa [#allocation11], 1 }

</bundles_post_ra>
